<compile_context>
chip_gen: v5e
topology: v5e:2x2
jax: 0.10.0
libtpu: 0.0.40
codegen_flags: <defaults>
</compile_context>

<pallas_src>
import functools

import jax
import jax.numpy as jnp
from jax.experimental import pallas as pl
from jax.experimental.pallas import tpu as pltpu


def _round_up(x, m):
    return ((x + m - 1) // m) * m


def _full_spec(a):
    nd = a.ndim
    return pl.BlockSpec(a.shape, lambda b, l, _nd=nd: (0,) * _nd)


def _light_attention_kernel(xm_ref, xh_ref, wfa_ref, bfa_ref,
                            w1a_ref, w1b_ref, b1_ref, bns_ref, bnb_ref,
                            w2_ref, b2_ref, out_ref,
                            m_ref, s_ref, ws_ref, fm_ref,
                            *, K, TL, L_valid, approx_recip):
    l = pl.program_id(1)
    n_l = pl.num_programs(1)
    Ep = xm_ref.shape[-1]

    # ---- init running statistics at the first L-chunk of each batch row ----
    @pl.when(l == 0)
    def _():
        m_ref[...] = jnp.full(m_ref.shape, -jnp.inf, m_ref.dtype)
        s_ref[...] = jnp.zeros(s_ref.shape, s_ref.dtype)
        ws_ref[...] = jnp.zeros(ws_ref.shape, ws_ref.dtype)
        fm_ref[...] = jnp.full(fm_ref.shape, -jnp.inf, fm_ref.dtype)

    # ---- fused feature+attention conv for this chunk: K MXU matmuls ----
    # window = TL main rows + (K-1) halo rows of the zero-padded sequence.
    window = jnp.concatenate([xm_ref[...], xh_ref[:K - 1, :]], axis=0)  # [TL+K-1, Ep]
    acc = jnp.zeros((TL, 2 * Ep), jnp.float32)
    for k in range(K):            # K is small & static -> unrolled
        # NOTE: sublane-offset slices may materialise a VMEM copy, but with
        # 2*Ep MACs per loaded element the MXU dominates; vld/vst stays slack.
        acc = acc + jnp.dot(window[k:k + TL, :], wfa_ref[k],
                            preferred_element_type=jnp.float32)
    acc = acc + bfa_ref[...]                                   # [1, 2Ep] broadcast
    feat = acc[:, :Ep]            # feature conv output   [TL, Ep]
    attn = acc[:, Ep:]            # attention conv output [TL, Ep]

    # ---- mask grid-alignment rows past the true sequence length ----
    rows = jax.lax.broadcasted_iota(jnp.int32, (TL, 1), 0) + l * TL
    valid = rows < L_valid                                     # [TL, 1]
    attn_m = jnp.where(valid, attn, -jnp.inf)

    # ---- online softmax over the sequence axis (per channel) ----
    c_max = jnp.max(attn_m, axis=0, keepdims=True)             # [1, Ep]
    m_new = jnp.maximum(m_ref[...], c_max)
    alpha = jnp.exp(m_ref[...] - m_new)
    p = jnp.exp(attn_m - m_new)                                # 0 on masked rows
    s_ref[...] = alpha * s_ref[...] + jnp.sum(p, axis=0, keepdims=True)
    ws_ref[...] = alpha * ws_ref[...] + jnp.sum(p * feat, axis=0, keepdims=True)
    fm_ref[...] = jnp.maximum(
        fm_ref[...],
        jnp.max(jnp.where(valid, feat, -jnp.inf), axis=0, keepdims=True))
    m_ref[...] = m_new

    # ---- epilogue once per batch row, after the last L-chunk ----
    @pl.when(l == n_l - 1)
    def _():
        # deferred softmax normalisation: one [1, Ep] reciprocal instead of a
        # full [TL, Ep] divide per chunk.
        apool = ws_ref[...] * pl.reciprocal(s_ref[...], approx=approx_recip)
        mpool = fm_ref[...]
        h = (jnp.dot(apool, w1a_ref[...], preferred_element_type=jnp.float32)
             + jnp.dot(mpool, w1b_ref[...], preferred_element_type=jnp.float32)
             + b1_ref[...])                                    # Linear(2E -> 32)
        h = jnp.maximum(h, 0.0)                                # ReLU
        h = h * bns_ref[...] + bnb_ref[...]                    # BatchNorm1d (eval, folded)
        logits = (jnp.dot(h, w2_ref[...], preferred_element_type=jnp.float32)
                  + b2_ref[...])                               # [1, DP]
        out_ref[...] = jnp.broadcast_to(logits, out_ref.shape)


def light_attention_forward(x, params, *, eps=1e-5, tl=None,
                            compute_dtype=jnp.float32):
    """x: [B, E, L] float32 (PyTorch NCW).  Returns [B, output_dim] logits."""
    B, E, L = x.shape
    K = params['wf'].shape[-1]
    assert K % 2 == 1, "odd kernel_size assumed (module default 9)"
    pad = K // 2
    H = params['w1'].shape[0]
    Dout = params['w2'].shape[0]
    itemsize = jnp.dtype(compute_dtype).itemsize

    # ---- lane-dense channel padding (E and output dim to multiples of 128) ----
    Ep = _round_up(E, 128)
    DP = _round_up(Dout, 128)

    # ---- halo & L-chunk sizing (per-generation VMEM aware) ----
    TLh = _round_up(max(K - 1, 16), 16)          # halo rows (>= K-1, bf16-friendly)
    try:
        vmem_cap = int(pltpu.get_tpu_info().vmem_capacity_bytes)
    except Exception:
        vmem_cap = 64 * 1024 * 1024              # conservative default (v7x)
    # TODO(synk): for very large E (f32 E>~1500 / bf16 E>~2000 on v7x) the
    # fused K*Ep*2Ep conv weight no longer fits VMEM-resident; add an
    # output-channel grid axis that streams weight chunks instead (or use
    # compute_dtype=bfloat16, which halves the weight footprint).
    wfa_bytes = K * Ep * (2 * Ep) * itemsize
    if tl is None:
        # keep double-buffered x blocks + f32 per-chunk temporaries comfortably
        # inside VMEM next to the resident fused conv weights.
        per_row = Ep * (4 * itemsize + 40)
        avail = max(int(0.8 * vmem_cap) - wfa_bytes - (2 << 20), per_row * TLh)
        tl = max(TLh, min(1024, avail // per_row))
    tl = max(TLh, (min(int(tl), _round_up(L, TLh)) // TLh) * TLh)

    nlb = -(-L // tl)                            # number of L chunks
    Ltot = nlb * tl + TLh                        # padded sequence length
    halo_stride = tl // TLh

    # ---- prepare inputs: single fused transpose+pad+cast pass (under jit) ----
    x_nwc = jnp.transpose(x, (0, 2, 1))                                  # [B, L, E]
    x_p = jnp.pad(x_nwc, ((0, 0), (pad, Ltot - L - pad), (0, Ep - E)))
    x_p = x_p.astype(compute_dtype)                                      # [B, Ltot, Ep]

    # Fused conv weights: [Eout, Ein, K] -> [K, Ein_p, Eout_p], feature || attention.
    def conv_w(w):
        wt = jnp.transpose(w, (2, 1, 0))                                 # [K, Ein, Eout]
        return jnp.pad(wt, ((0, 0), (0, Ep - E), (0, Ep - E)))
    wfa = jnp.concatenate([conv_w(params['wf']), conv_w(params['wa'])],
                          axis=2).astype(compute_dtype)                  # [K, Ep, 2Ep]
    bfa = jnp.concatenate([jnp.pad(params['bf'], (0, Ep - E)),
                           jnp.pad(params['ba'], (0, Ep - E))]).reshape(1, 2 * Ep)

    # Linear(2E, 32): attention-pool half / max-pool half, transposed + padded.
    w1 = params['w1']                                                    # [H, 2E]
    w1a = jnp.pad(jnp.transpose(w1[:, :E]), ((0, Ep - E), (0, 0)))       # [Ep, H]
    w1b = jnp.pad(jnp.transpose(w1[:, E:]), ((0, Ep - E), (0, 0)))       # [Ep, H]
    b1 = params['b1'].reshape(1, H)

    # Eval-mode BatchNorm1d folded into scale/shift.
    bns = (params['bn_gamma'] / jnp.sqrt(params['bn_var'] + eps)).reshape(1, H)
    bnb = (params['bn_beta'] - params['bn_mean'] * bns[0]).reshape(1, H)

    w2 = jnp.pad(jnp.transpose(params['w2']), ((0, 0), (0, DP - Dout)))  # [H, DP]
    b2 = jnp.pad(params['b2'], (0, DP - Dout)).reshape(1, DP)

    # ---- grid & specs ----
    grid = (B, nlb)
    in_specs = [
        # main TL rows of this chunk
        pl.BlockSpec((None, tl, Ep), lambda b, l: (b, l, 0)),
        # TLh-row halo starting at the next chunk (non-overlapping blocks)
        pl.BlockSpec((None, TLh, Ep), lambda b, l: (b, (l + 1) * halo_stride, 0)),
        _full_spec(wfa), _full_spec(bfa), _full_spec(w1a), _full_spec(w1b),
        _full_spec(b1), _full_spec(bns), _full_spec(bnb),
        _full_spec(w2), _full_spec(b2),
    ]
    # 8 sublane rows keep the store block (8,128)-aligned; row 0 holds the logits.
    out_spec = pl.BlockSpec((None, 8, DP), lambda b, l: (b, 0, 0))

    est = (wfa_bytes + 4 * (tl + TLh) * Ep * itemsize
           + 8 * tl * 2 * Ep * 4 + (8 << 20))
    vmem_limit = int(min(0.9 * vmem_cap, max(32 << 20, est)))

    out = pl.pallas_call(
        functools.partial(_light_attention_kernel, K=K, TL=tl, L_valid=L,
                          approx_recip=(jnp.dtype(compute_dtype)
                                        != jnp.dtype(jnp.float32))),
        out_shape=jax.ShapeDtypeStruct((B, 8, DP), jnp.float32),
        grid_spec=pltpu.PrefetchScalarGridSpec(
            num_scalar_prefetch=0,
            grid=grid,
            in_specs=in_specs,
            out_specs=out_spec,
            scratch_shapes=[pltpu.VMEM((1, Ep), jnp.float32)] * 4),
        compiler_params=pltpu.CompilerParams(
            dimension_semantics=("parallel", "arbitrary"),
            vmem_limit_bytes=vmem_limit),
    )(x_p, x_p, wfa, bfa, w1a, w1b, b1, bns, bnb, w2, b2)

    return out[:, 0, :Dout]


def ref_forward(x, params, eps=1e-5):
    """Pure-JAX reference (eval-mode semantics) for validation."""
    K = params['wf'].shape[-1]
    pad = K // 2

    def conv1d(x, w, b):
        y = jax.lax.conv_general_dilated(
            x, w, window_strides=(1,), padding=[(pad, pad)],
            dimension_numbers=('NCH', 'OIH', 'NCH'))
        return y + b[None, :, None]

    feat = conv1d(x, params['wf'], params['bf'])
    attn = conv1d(x, params['wa'], params['ba'])
    sm = jax.nn.softmax(attn, axis=-1)
    apool = jnp.sum(feat * sm, axis=-1)
    mpool = jnp.max(feat, axis=-1)
    cat = jnp.concatenate([apool, mpool], axis=-1)
    h = cat @ params['w1'].T + params['b1']
    h = jnp.maximum(h, 0.0)
    h = ((h - params['bn_mean']) / jnp.sqrt(params['bn_var'] + eps)
         * params['bn_gamma'] + params['bn_beta'])
    return h @ params['w2'].T + params['b2']


if __name__ == "__main__":
    # Small shapes consistent with the module: x = [batch, embeddings_dim, seq_len].
    B, E, L, K, H, DOUT = 2, 32, 50, 9, 32, 10

    key = jax.random.PRNGKey(0)
    ks = jax.random.split(key, 13)
    f32 = jnp.float32
    params = {
        'wf': 0.05 * jax.random.normal(ks[0], (E, E, K), f32),
        'bf': 0.05 * jax.random.normal(ks[1], (E,), f32),
        'wa': 0.05 * jax.random.normal(ks[2], (E, E, K), f32),
        'ba': 0.05 * jax.random.normal(ks[3], (E,), f32),
        'w1': 0.05 * jax.random.normal(ks[4], (H, 2 * E), f32),
        'b1': 0.05 * jax.random.normal(ks[5], (H,), f32),
        'bn_gamma': 1.0 + 0.1 * jax.random.normal(ks[6], (H,), f32),
        'bn_beta': 0.1 * jax.random.normal(ks[7], (H,), f32),
        'bn_mean': 0.1 * jax.random.normal(ks[8], (H,), f32),
        'bn_var': 1.0 + 0.1 * jax.random.uniform(ks[9], (H,), f32),
        'w2': 0.05 * jax.random.normal(ks[10], (DOUT, H), f32),
        'b2': 0.05 * jax.random.normal(ks[11], (DOUT,), f32),
    }
    x = jax.random.normal(ks[12], (B, E, L), f32)

    ref = jax.block_until_ready(ref_forward(x, params))

    # f32 path; tl=16 forces several L-chunks so the online-softmax, halo and
    # tail-masking logic are all exercised even at this small L.
    fwd = jax.jit(functools.partial(light_attention_forward, tl=16))
    out = jax.block_until_ready(fwd(x, params))
    assert out.shape == (B, DOUT), out.shape
    assert jnp.allclose(out, ref, rtol=1e-4, atol=1e-4), (out, ref)

    # bf16 MXU path (halved HBM/VMEM bytes for x + conv weights); f32 accumulate,
    # so only input-rounding noise -> looser tolerance.
    fwd_bf16 = jax.jit(functools.partial(light_attention_forward, tl=16,
                                         compute_dtype=jnp.bfloat16))
    out16 = jax.block_until_ready(fwd_bf16(x, params))
    assert out16.shape == (B, DOUT), out16.shape
    assert jnp.allclose(out16, ref, rtol=5e-2, atol=5e-2), (out16, ref)

    print("KERNEL_OK")
</pallas_src>

<mosaic_0001>
module attributes {stable_mosaic.version = 11 : i64} {
  func.func @_light_attention_kernel(%arg0: i32, %arg1: i32, %arg2: memref<1x16x128xf32, #tpu.memory_space<vmem>>, %arg3: memref<1x16x128xf32, #tpu.memory_space<vmem>>, %arg4: memref<9x128x256xf32, #tpu.memory_space<vmem>>, %arg5: memref<1x256xf32, #tpu.memory_space<vmem>>, %arg6: memref<128x32xf32, #tpu.memory_space<vmem>>, %arg7: memref<128x32xf32, #tpu.memory_space<vmem>>, %arg8: memref<1x32xf32, #tpu.memory_space<vmem>>, %arg9: memref<1x32xf32, #tpu.memory_space<vmem>>, %arg10: memref<1x32xf32, #tpu.memory_space<vmem>>, %arg11: memref<32x128xf32, #tpu.memory_space<vmem>>, %arg12: memref<1x128xf32, #tpu.memory_space<vmem>>, %arg13: memref<1x8x128xf32, #tpu.memory_space<vmem>>, %arg14: memref<1x128xf32, #tpu.memory_space<vmem>>, %arg15: memref<1x128xf32, #tpu.memory_space<vmem>>, %arg16: memref<1x128xf32, #tpu.memory_space<vmem>>, %arg17: memref<1x128xf32, #tpu.memory_space<vmem>>) attributes {dimension_semantics = [#tpu.dimension_semantics<parallel>, #tpu.dimension_semantics<arbitrary>], iteration_bounds = array<i64: 2, 4>, scalar_prefetch = 0 : i64, scratch_operands = 4 : i64, tpu.core_type = #tpu.core_type<tc>, window_params = [{transform_indices = @transform_0, window_bounds = array<i64: 1, 16, 128>}, {transform_indices = @transform_1, window_bounds = array<i64: 1, 16, 128>}, {pipeline_mode = #tpu.pipeline_mode<synchronous>, transform_indices = @transform_2, window_bounds = array<i64: 9, 128, 256>}, {pipeline_mode = #tpu.pipeline_mode<synchronous>, transform_indices = @transform_3, window_bounds = array<i64: 1, 256>}, {pipeline_mode = #tpu.pipeline_mode<synchronous>, transform_indices = @transform_4, window_bounds = array<i64: 128, 32>}, {pipeline_mode = #tpu.pipeline_mode<synchronous>, transform_indices = @transform_5, window_bounds = array<i64: 128, 32>}, {pipeline_mode = #tpu.pipeline_mode<synchronous>, transform_indices = @transform_6, window_bounds = array<i64: 1, 32>}, {pipeline_mode = #tpu.pipeline_mode<synchronous>, transform_indices = @transform_7, window_bounds = array<i64: 1, 32>}, {pipeline_mode = #tpu.pipeline_mode<synchronous>, transform_indices = @transform_8, window_bounds = array<i64: 1, 32>}, {pipeline_mode = #tpu.pipeline_mode<synchronous>, transform_indices = @transform_9, window_bounds = array<i64: 32, 128>}, {pipeline_mode = #tpu.pipeline_mode<synchronous>, transform_indices = @transform_10, window_bounds = array<i64: 1, 128>}, {transform_indices = @transform_11, window_bounds = array<i64: 1, 8, 128>}]} {
    %c0_i32 = arith.constant 0 : i32
    %0 = arith.cmpi eq, %arg1, %c0_i32 : i32
    %1 = arith.extui %0 : i1 to i32
    %c0_i32_0 = arith.constant 0 : i32
    %2 = arith.cmpi ne, %1, %c0_i32_0 : i32
    scf.if %2 {
      %cst_61 = arith.constant 0xFF800000 : f32
      %105 = vector.broadcast %cst_61 : f32 to vector<1x128xf32>
      %c0_62 = arith.constant 0 : index
      %c0_63 = arith.constant 0 : index
      %106 = vector.load %arg14[%c0_62, %c0_63] : memref<1x128xf32, #tpu.memory_space<vmem>>, vector<1x128xf32>
      tpu.vector_store %arg14[%c0_62, %c0_63], %105 {strides = array<i32>} : memref<1x128xf32, #tpu.memory_space<vmem>>, vector<1x128xf32>,
      %cst_64 = arith.constant 0.000000e+00 : f32
      %107 = vector.broadcast %cst_64 : f32 to vector<1x128xf32>
      %c0_65 = arith.constant 0 : index
      %c0_66 = arith.constant 0 : index
      %108 = vector.load %arg15[%c0_65, %c0_66] : memref<1x128xf32, #tpu.memory_space<vmem>>, vector<1x128xf32>
      tpu.vector_store %arg15[%c0_65, %c0_66], %107 {strides = array<i32>} : memref<1x128xf32, #tpu.memory_space<vmem>>, vector<1x128xf32>,
      %cst_67 = arith.constant 0.000000e+00 : f32
      %109 = vector.broadcast %cst_67 : f32 to vector<1x128xf32>
      %c0_68 = arith.constant 0 : index
      %c0_69 = arith.constant 0 : index
      %110 = vector.load %arg16[%c0_68, %c0_69] : memref<1x128xf32, #tpu.memory_space<vmem>>, vector<1x128xf32>
      tpu.vector_store %arg16[%c0_68, %c0_69], %109 {strides = array<i32>} : memref<1x128xf32, #tpu.memory_space<vmem>>, vector<1x128xf32>,
      %cst_70 = arith.constant 0xFF800000 : f32
      %111 = vector.broadcast %cst_70 : f32 to vector<1x128xf32>
      %c0_71 = arith.constant 0 : index
      %c0_72 = arith.constant 0 : index
      %112 = vector.load %arg17[%c0_71, %c0_72] : memref<1x128xf32, #tpu.memory_space<vmem>>, vector<1x128xf32>
      tpu.vector_store %arg17[%c0_71, %c0_72], %111 {strides = array<i32>} : memref<1x128xf32, #tpu.memory_space<vmem>>, vector<1x128xf32>,
    } else {
    }
    %c0 = arith.constant 0 : index
    %c0_1 = arith.constant 0 : index
    %c0_2 = arith.constant 0 : index
    %3 = vector.load %arg2[%c0, %c0_1, %c0_2] : memref<1x16x128xf32, #tpu.memory_space<vmem>>, vector<1x16x128xf32>
    %4 = vector.shape_cast %3 : vector<1x16x128xf32> to vector<16x128xf32>
    %c0_3 = arith.constant 0 : index
    %c0_4 = arith.constant 0 : index
    %c0_5 = arith.constant 0 : index
    %5 = vector.load %arg3[%c0_3, %c0_4, %c0_5] : memref<1x16x128xf32, #tpu.memory_space<vmem>>, vector<1x8x128xf32>
    %6 = vector.shape_cast %5 : vector<1x8x128xf32> to vector<8x128xf32>
    %7 = tpu.concatenate %4, %6 in 0 : vector<16x128xf32>, vector<8x128xf32> -> vector<24x128xf32>
    %cst = arith.constant 0.000000e+00 : f32
    %8 = vector.broadcast %cst : f32 to vector<16x256xf32>
    %9 = vector.extract_strided_slice %7 {offsets = [0, 0], sizes = [16, 128], strides = [1, 1]} : vector<24x128xf32> to vector<16x128xf32>
    %c0_6 = arith.constant 0 : index
    %c0_7 = arith.constant 0 : index
    %c0_8 = arith.constant 0 : index
    %10 = vector.load %arg4[%c0_6, %c0_7, %c0_8] : memref<9x128x256xf32, #tpu.memory_space<vmem>>, vector<1x128x256xf32>
    %11 = vector.shape_cast %10 : vector<1x128x256xf32> to vector<128x256xf32>
    %cst_9 = arith.constant dense<0.000000e+00> : vector<16x256xf32>
    %12 = tpu.matmul %9, %11, %cst_9 {dimension_numbers = #tpu.dot_dimension_numbers<[1], [0], [0], [1], [0, 0, 1, 1], [], []>} : vector<16x128xf32>, vector<128x256xf32>, vector<16x256xf32> -> vector<16x256xf32>
    %13 = arith.addf %8, %12 : vector<16x256xf32>
    %14 = vector.extract_strided_slice %7 {offsets = [1, 0], sizes = [16, 128], strides = [1, 1]} : vector<24x128xf32> to vector<16x128xf32>
    %c1 = arith.constant 1 : index
    %c0_10 = arith.constant 0 : index
    %c0_11 = arith.constant 0 : index
    %15 = vector.load %arg4[%c1, %c0_10, %c0_11] : memref<9x128x256xf32, #tpu.memory_space<vmem>>, vector<1x128x256xf32>
    %16 = vector.shape_cast %15 : vector<1x128x256xf32> to vector<128x256xf32>
    %cst_12 = arith.constant dense<0.000000e+00> : vector<16x256xf32>
    %17 = tpu.matmul %14, %16, %cst_12 {dimension_numbers = #tpu.dot_dimension_numbers<[1], [0], [0], [1], [0, 0, 1, 1], [], []>} : vector<16x128xf32>, vector<128x256xf32>, vector<16x256xf32> -> vector<16x256xf32>
    %18 = arith.addf %13, %17 : vector<16x256xf32>
    %19 = vector.extract_strided_slice %7 {offsets = [2, 0], sizes = [16, 128], strides = [1, 1]} : vector<24x128xf32> to vector<16x128xf32>
    %c2 = arith.constant 2 : index
    %c0_13 = arith.constant 0 : index
    %c0_14 = arith.constant 0 : index
    %20 = vector.load %arg4[%c2, %c0_13, %c0_14] : memref<9x128x256xf32, #tpu.memory_space<vmem>>, vector<1x128x256xf32>
    %21 = vector.shape_cast %20 : vector<1x128x256xf32> to vector<128x256xf32>
    %cst_15 = arith.constant dense<0.000000e+00> : vector<16x256xf32>
    %22 = tpu.matmul %19, %21, %cst_15 {dimension_numbers = #tpu.dot_dimension_numbers<[1], [0], [0], [1], [0, 0, 1, 1], [], []>} : vector<16x128xf32>, vector<128x256xf32>, vector<16x256xf32> -> vector<16x256xf32>
    %23 = arith.addf %18, %22 : vector<16x256xf32>
    %24 = vector.extract_strided_slice %7 {offsets = [3, 0], sizes = [16, 128], strides = [1, 1]} : vector<24x128xf32> to vector<16x128xf32>
    %c3 = arith.constant 3 : index
    %c0_16 = arith.constant 0 : index
    %c0_17 = arith.constant 0 : index
    %25 = vector.load %arg4[%c3, %c0_16, %c0_17] : memref<9x128x256xf32, #tpu.memory_space<vmem>>, vector<1x128x256xf32>
    %26 = vector.shape_cast %25 : vector<1x128x256xf32> to vector<128x256xf32>
    %cst_18 = arith.constant dense<0.000000e+00> : vector<16x256xf32>
    %27 = tpu.matmul %24, %26, %cst_18 {dimension_numbers = #tpu.dot_dimension_numbers<[1], [0], [0], [1], [0, 0, 1, 1], [], []>} : vector<16x128xf32>, vector<128x256xf32>, vector<16x256xf32> -> vector<16x256xf32>
    %28 = arith.addf %23, %27 : vector<16x256xf32>
    %29 = vector.extract_strided_slice %7 {offsets = [4, 0], sizes = [16, 128], strides = [1, 1]} : vector<24x128xf32> to vector<16x128xf32>
    %c4 = arith.constant 4 : index
    %c0_19 = arith.constant 0 : index
    %c0_20 = arith.constant 0 : index
    %30 = vector.load %arg4[%c4, %c0_19, %c0_20] : memref<9x128x256xf32, #tpu.memory_space<vmem>>, vector<1x128x256xf32>
    %31 = vector.shape_cast %30 : vector<1x128x256xf32> to vector<128x256xf32>
    %cst_21 = arith.constant dense<0.000000e+00> : vector<16x256xf32>
    %32 = tpu.matmul %29, %31, %cst_21 {dimension_numbers = #tpu.dot_dimension_numbers<[1], [0], [0], [1], [0, 0, 1, 1], [], []>} : vector<16x128xf32>, vector<128x256xf32>, vector<16x256xf32> -> vector<16x256xf32>
    %33 = arith.addf %28, %32 : vector<16x256xf32>
    %34 = vector.extract_strided_slice %7 {offsets = [5, 0], sizes = [16, 128], strides = [1, 1]} : vector<24x128xf32> to vector<16x128xf32>
    %c5 = arith.constant 5 : index
    %c0_22 = arith.constant 0 : index
    %c0_23 = arith.constant 0 : index
    %35 = vector.load %arg4[%c5, %c0_22, %c0_23] : memref<9x128x256xf32, #tpu.memory_space<vmem>>, vector<1x128x256xf32>
    %36 = vector.shape_cast %35 : vector<1x128x256xf32> to vector<128x256xf32>
    %cst_24 = arith.constant dense<0.000000e+00> : vector<16x256xf32>
    %37 = tpu.matmul %34, %36, %cst_24 {dimension_numbers = #tpu.dot_dimension_numbers<[1], [0], [0], [1], [0, 0, 1, 1], [], []>} : vector<16x128xf32>, vector<128x256xf32>, vector<16x256xf32> -> vector<16x256xf32>
    %38 = arith.addf %33, %37 : vector<16x256xf32>
    %39 = vector.extract_strided_slice %7 {offsets = [6, 0], sizes = [16, 128], strides = [1, 1]} : vector<24x128xf32> to vector<16x128xf32>
    %c6 = arith.constant 6 : index
    %c0_25 = arith.constant 0 : index
    %c0_26 = arith.constant 0 : index
    %40 = vector.load %arg4[%c6, %c0_25, %c0_26] : memref<9x128x256xf32, #tpu.memory_space<vmem>>, vector<1x128x256xf32>
    %41 = vector.shape_cast %40 : vector<1x128x256xf32> to vector<128x256xf32>
    %cst_27 = arith.constant dense<0.000000e+00> : vector<16x256xf32>
    %42 = tpu.matmul %39, %41, %cst_27 {dimension_numbers = #tpu.dot_dimension_numbers<[1], [0], [0], [1], [0, 0, 1, 1], [], []>} : vector<16x128xf32>, vector<128x256xf32>, vector<16x256xf32> -> vector<16x256xf32>
    %43 = arith.addf %38, %42 : vector<16x256xf32>
    %44 = vector.extract_strided_slice %7 {offsets = [7, 0], sizes = [16, 128], strides = [1, 1]} : vector<24x128xf32> to vector<16x128xf32>
    %c7 = arith.constant 7 : index
    %c0_28 = arith.constant 0 : index
    %c0_29 = arith.constant 0 : index
    %45 = vector.load %arg4[%c7, %c0_28, %c0_29] : memref<9x128x256xf32, #tpu.memory_space<vmem>>, vector<1x128x256xf32>
    %46 = vector.shape_cast %45 : vector<1x128x256xf32> to vector<128x256xf32>
    %cst_30 = arith.constant dense<0.000000e+00> : vector<16x256xf32>
    %47 = tpu.matmul %44, %46, %cst_30 {dimension_numbers = #tpu.dot_dimension_numbers<[1], [0], [0], [1], [0, 0, 1, 1], [], []>} : vector<16x128xf32>, vector<128x256xf32>, vector<16x256xf32> -> vector<16x256xf32>
    %48 = arith.addf %43, %47 : vector<16x256xf32>
    %49 = vector.extract_strided_slice %7 {offsets = [8, 0], sizes = [16, 128], strides = [1, 1]} : vector<24x128xf32> to vector<16x128xf32>
    %c8 = arith.constant 8 : index
    %c0_31 = arith.constant 0 : index
    %c0_32 = arith.constant 0 : index
    %50 = vector.load %arg4[%c8, %c0_31, %c0_32] : memref<9x128x256xf32, #tpu.memory_space<vmem>>, vector<1x128x256xf32>
    %51 = vector.shape_cast %50 : vector<1x128x256xf32> to vector<128x256xf32>
    %cst_33 = arith.constant dense<0.000000e+00> : vector<16x256xf32>
    %52 = tpu.matmul %49, %51, %cst_33 {dimension_numbers = #tpu.dot_dimension_numbers<[1], [0], [0], [1], [0, 0, 1, 1], [], []>} : vector<16x128xf32>, vector<128x256xf32>, vector<16x256xf32> -> vector<16x256xf32>
    %53 = arith.addf %48, %52 : vector<16x256xf32>
    %c0_34 = arith.constant 0 : index
    %c0_35 = arith.constant 0 : index
    %54 = vector.load %arg5[%c0_34, %c0_35] : memref<1x256xf32, #tpu.memory_space<vmem>>, vector<1x256xf32>
    %55 = vector.broadcast %54 : vector<1x256xf32> to vector<16x256xf32>
    %56 = arith.addf %53, %55 : vector<16x256xf32>
    %57 = vector.extract_strided_slice %56 {offsets = [0, 0], sizes = [16, 128], strides = [1, 1]} : vector<16x256xf32> to vector<16x128xf32>
    %58 = vector.extract_strided_slice %56 {offsets = [0, 128], sizes = [16, 128], strides = [1, 1]} : vector<16x256xf32> to vector<16x128xf32>
    %59 = tpu.iota {dimensions = array<i32: 0>} : vector<16x1xi32>
    %c16_i32 = arith.constant 16 : i32
    %60 = arith.muli %arg1, %c16_i32 : i32
    %61 = vector.broadcast %60 : i32 to vector<16x1xi32>
    %62 = arith.addi %59, %61 : vector<16x1xi32>
    %c50_i32 = arith.constant 50 : i32
    %63 = vector.broadcast %c50_i32 : i32 to vector<16x1xi32>
    %64 = arith.cmpi slt, %62, %63 : vector<16x1xi32>
    %cst_36 = arith.constant 0xFF800000 : f32
    %65 = vector.shape_cast %64 : vector<16x1xi1> to vector<16x1xi1>
    %66 = vector.broadcast %65 : vector<16x1xi1> to vector<16x128xi1>
    %67 = vector.broadcast %cst_36 : f32 to vector<16x128xf32>
    %68 = arith.select %66, %58, %67 : vector<16x128xi1>, vector<16x128xf32>
    %cst_37 = arith.constant dense<0xFF800000> : vector<128xf32>
    %69 = vector.multi_reduction <maximumf>, %68, %cst_37 [0] : vector<16x128xf32> to vector<128xf32>
    %70 = vector.shape_cast %69 : vector<128xf32> to vector<1x128xf32>
    %c0_38 = arith.constant 0 : index
    %c0_39 = arith.constant 0 : index
    %71 = vector.load %arg14[%c0_38, %c0_39] : memref<1x128xf32, #tpu.memory_space<vmem>>, vector<1x128xf32>
    %72 = arith.maximumf %71, %70 : vector<1x128xf32>
    %c0_40 = arith.constant 0 : index
    %c0_41 = arith.constant 0 : index
    %73 = vector.load %arg14[%c0_40, %c0_41] : memref<1x128xf32, #tpu.memory_space<vmem>>, vector<1x128xf32>
    %74 = arith.subf %73, %72 : vector<1x128xf32>
    %75 = math.exp %74 : vector<1x128xf32>
    %76 = vector.broadcast %72 : vector<1x128xf32> to vector<16x128xf32>
    %77 = arith.subf %68, %76 : vector<16x128xf32>
    %78 = math.exp %77 : vector<16x128xf32>
    %c0_42 = arith.constant 0 : index
    %c0_43 = arith.constant 0 : index
    %79 = vector.load %arg15[%c0_42, %c0_43] : memref<1x128xf32, #tpu.memory_space<vmem>>, vector<1x128xf32>
    %80 = arith.mulf %75, %79 : vector<1x128xf32>
    %cst_44 = arith.constant dense<0.000000e+00> : vector<128xf32>
    %81 = vector.multi_reduction <add>, %78, %cst_44 [0] : vector<16x128xf32> to vector<128xf32>
    %82 = vector.shape_cast %81 : vector<128xf32> to vector<1x128xf32>
    %83 = arith.addf %80, %82 : vector<1x128xf32>
    %c0_45 = arith.constant 0 : index
    %c0_46 = arith.constant 0 : index
    %84 = vector.load %arg15[%c0_45, %c0_46] : memref<1x128xf32, #tpu.memory_space<vmem>>, vector<1x128xf32>
    tpu.vector_store %arg15[%c0_45, %c0_46], %83 {strides = array<i32>} : memref<1x128xf32, #tpu.memory_space<vmem>>, vector<1x128xf32>,
    %c0_47 = arith.constant 0 : index
    %c0_48 = arith.constant 0 : index
    %85 = vector.load %arg16[%c0_47, %c0_48] : memref<1x128xf32, #tpu.memory_space<vmem>>, vector<1x128xf32>
    %86 = arith.mulf %75, %85 : vector<1x128xf32>
    %87 = arith.mulf %78, %57 : vector<16x128xf32>
    %cst_49 = arith.constant dense<0.000000e+00> : vector<128xf32>
    %88 = vector.multi_reduction <add>, %87, %cst_49 [0] : vector<16x128xf32> to vector<128xf32>
    %89 = vector.shape_cast %88 : vector<128xf32> to vector<1x128xf32>
    %90 = arith.addf %86, %89 : vector<1x128xf32>
    %c0_50 = arith.constant 0 : index
    %c0_51 = arith.constant 0 : index
    %91 = vector.load %arg16[%c0_50, %c0_51] : memref<1x128xf32, #tpu.memory_space<vmem>>, vector<1x128xf32>
    tpu.vector_store %arg16[%c0_50, %c0_51], %90 {strides = array<i32>} : memref<1x128xf32, #tpu.memory_space<vmem>>, vector<1x128xf32>,
    %c0_52 = arith.constant 0 : index
    %c0_53 = arith.constant 0 : index
    %92 = vector.load %arg17[%c0_52, %c0_53] : memref<1x128xf32, #tpu.memory_space<vmem>>, vector<1x128xf32>
    %cst_54 = arith.constant 0xFF800000 : f32
    %93 = vector.shape_cast %64 : vector<16x1xi1> to vector<16x1xi1>
    %94 = vector.broadcast %93 : vector<16x1xi1> to vector<16x128xi1>
    %95 = vector.broadcast %cst_54 : f32 to vector<16x128xf32>
    %96 = arith.select %94, %57, %95 : vector<16x128xi1>, vector<16x128xf32>
    %cst_55 = arith.constant dense<0xFF800000> : vector<128xf32>
    %97 = vector.multi_reduction <maximumf>, %96, %cst_55 [0] : vector<16x128xf32> to vector<128xf32>
    %98 = vector.shape_cast %97 : vector<128xf32> to vector<1x128xf32>
    %99 = arith.maximumf %92, %98 : vector<1x128xf32>
    %c0_56 = arith.constant 0 : index
    %c0_57 = arith.constant 0 : index
    %100 = vector.load %arg17[%c0_56, %c0_57] : memref<1x128xf32, #tpu.memory_space<vmem>>, vector<1x128xf32>
    tpu.vector_store %arg17[%c0_56, %c0_57], %99 {strides = array<i32>} : memref<1x128xf32, #tpu.memory_space<vmem>>, vector<1x128xf32>,
    %c0_58 = arith.constant 0 : index
    %c0_59 = arith.constant 0 : index
    %101 = vector.load %arg14[%c0_58, %c0_59] : memref<1x128xf32, #tpu.memory_space<vmem>>, vector<1x128xf32>
    tpu.vector_store %arg14[%c0_58, %c0_59], %72 {strides = array<i32>} : memref<1x128xf32, #tpu.memory_space<vmem>>, vector<1x128xf32>,
    %c3_i32 = arith.constant 3 : i32
    %102 = arith.cmpi eq, %arg1, %c3_i32 : i32
    %103 = arith.extui %102 : i1 to i32
    %c0_i32_60 = arith.constant 0 : i32
    %104 = arith.cmpi ne, %103, %c0_i32_60 : i32
    scf.if %104 {
      %c0_61 = arith.constant 0 : index
      %c0_62 = arith.constant 0 : index
      %105 = vector.load %arg16[%c0_61, %c0_62] : memref<1x128xf32, #tpu.memory_space<vmem>>, vector<1x128xf32>
      %c0_63 = arith.constant 0 : index
      %c0_64 = arith.constant 0 : index
      %106 = vector.load %arg15[%c0_63, %c0_64] : memref<1x128xf32, #tpu.memory_space<vmem>>, vector<1x128xf32>
      %107 = tpu.reciprocal %106 : vector<1x128xf32> -> vector<1x128xf32>
      %108 = arith.mulf %105, %107 : vector<1x128xf32>
      %c0_65 = arith.constant 0 : index
      %c0_66 = arith.constant 0 : index
      %109 = vector.load %arg17[%c0_65, %c0_66] : memref<1x128xf32, #tpu.memory_space<vmem>>, vector<1x128xf32>
      %c0_67 = arith.constant 0 : index
      %c0_68 = arith.constant 0 : index
      %110 = vector.load %arg6[%c0_67, %c0_68] : memref<128x32xf32, #tpu.memory_space<vmem>>, vector<128x32xf32>
      %cst_69 = arith.constant dense<0.000000e+00> : vector<1x32xf32>
      %111 = tpu.matmul %108, %110, %cst_69 {dimension_numbers = #tpu.dot_dimension_numbers<[1], [0], [0], [1], [0, 0, 1, 1], [], []>} : vector<1x128xf32>, vector<128x32xf32>, vector<1x32xf32> -> vector<1x32xf32>
      %c0_70 = arith.constant 0 : index
      %c0_71 = arith.constant 0 : index
      %112 = vector.load %arg7[%c0_70, %c0_71] : memref<128x32xf32, #tpu.memory_space<vmem>>, vector<128x32xf32>
      %cst_72 = arith.constant dense<0.000000e+00> : vector<1x32xf32>
      %113 = tpu.matmul %109, %112, %cst_72 {dimension_numbers = #tpu.dot_dimension_numbers<[1], [0], [0], [1], [0, 0, 1, 1], [], []>} : vector<1x128xf32>, vector<128x32xf32>, vector<1x32xf32> -> vector<1x32xf32>
      %114 = arith.addf %111, %113 : vector<1x32xf32>
      %c0_73 = arith.constant 0 : index
      %c0_74 = arith.constant 0 : index
      %115 = vector.load %arg8[%c0_73, %c0_74] : memref<1x32xf32, #tpu.memory_space<vmem>>, vector<1x32xf32>
      %116 = arith.addf %114, %115 : vector<1x32xf32>
      %cst_75 = arith.constant 0.000000e+00 : f32
      %117 = vector.broadcast %cst_75 : f32 to vector<1x32xf32>
      %118 = arith.maximumf %116, %117 : vector<1x32xf32>
      %c0_76 = arith.constant 0 : index
      %c0_77 = arith.constant 0 : index
      %119 = vector.load %arg9[%c0_76, %c0_77] : memref<1x32xf32, #tpu.memory_space<vmem>>, vector<1x32xf32>
      %120 = arith.mulf %118, %119 : vector<1x32xf32>
      %c0_78 = arith.constant 0 : index
      %c0_79 = arith.constant 0 : index
      %121 = vector.load %arg10[%c0_78, %c0_79] : memref<1x32xf32, #tpu.memory_space<vmem>>, vector<1x32xf32>
      %122 = arith.addf %120, %121 : vector<1x32xf32>
      %c0_80 = arith.constant 0 : index
      %c0_81 = arith.constant 0 : index
      %123 = vector.load %arg11[%c0_80, %c0_81] : memref<32x128xf32, #tpu.memory_space<vmem>>, vector<32x128xf32>
      %cst_82 = arith.constant dense<0.000000e+00> : vector<1x128xf32>
      %124 = tpu.matmul %122, %123, %cst_82 {dimension_numbers = #tpu.dot_dimension_numbers<[1], [0], [0], [1], [0, 0, 1, 1], [], []>} : vector<1x32xf32>, vector<32x128xf32>, vector<1x128xf32> -> vector<1x128xf32>
      %c0_83 = arith.constant 0 : index
      %c0_84 = arith.constant 0 : index
      %125 = vector.load %arg12[%c0_83, %c0_84] : memref<1x128xf32, #tpu.memory_space<vmem>>, vector<1x128xf32>
      %126 = arith.addf %124, %125 : vector<1x128xf32>
      %127 = vector.shape_cast %126 : vector<1x128xf32> to vector<1x128xf32>
      %128 = vector.broadcast %127 : vector<1x128xf32> to vector<8x128xf32>
      %c0_85 = arith.constant 0 : index
      %c0_86 = arith.constant 0 : index
      %c0_87 = arith.constant 0 : index
      %129 = vector.load %arg13[%c0_85, %c0_86, %c0_87] : memref<1x8x128xf32, #tpu.memory_space<vmem>>, vector<1x8x128xf32>
      %130 = vector.shape_cast %129 : vector<1x8x128xf32> to vector<8x128xf32>
      %131 = vector.shape_cast %128 : vector<8x128xf32> to vector<1x8x128xf32>
      tpu.vector_store %arg13[%c0_85, %c0_86, %c0_87], %131 {strides = array<i32>} : memref<1x8x128xf32, #tpu.memory_space<vmem>>, vector<1x8x128xf32>,
    } else {
    }
    return
  }
  func.func @transform_0(%arg0: i32, %arg1: i32) -> (i32, i32, i32) {
    %c0_i32 = arith.constant 0 : i32
    %c0_i32_0 = arith.constant 0 : i32
    return %arg0, %arg1, %c0_i32 : i32, i32, i32
  }
  func.func @transform_1(%arg0: i32, %arg1: i32) -> (i32, i32, i32) {
    %c1_i32 = arith.constant 1 : i32
    %0 = arith.addi %arg1, %c1_i32 : i32
    %c1_i32_0 = arith.constant 1 : i32
    %1 = arith.muli %0, %c1_i32_0 : i32
    %c0_i32 = arith.constant 0 : i32
    %c0_i32_1 = arith.constant 0 : i32
    return %arg0, %1, %c0_i32 : i32, i32, i32
  }
  func.func @transform_2(%arg0: i32, %arg1: i32) -> (i32, i32, i32) {
    %c0_i32 = arith.constant 0 : i32
    %c0_i32_0 = arith.constant 0 : i32
    %c0_i32_1 = arith.constant 0 : i32
    %c0_i32_2 = arith.constant 0 : i32
    return %c0_i32, %c0_i32_0, %c0_i32_1 : i32, i32, i32
  }
  func.func @transform_3(%arg0: i32, %arg1: i32) -> (i32, i32) {
    %c0_i32 = arith.constant 0 : i32
    %c0_i32_0 = arith.constant 0 : i32
    %c0_i32_1 = arith.constant 0 : i32
    return %c0_i32, %c0_i32_0 : i32, i32
  }
  func.func @transform_4(%arg0: i32, %arg1: i32) -> (i32, i32) {
    %c0_i32 = arith.constant 0 : i32
    %c0_i32_0 = arith.constant 0 : i32
    %c0_i32_1 = arith.constant 0 : i32
    return %c0_i32, %c0_i32_0 : i32, i32
  }
  func.func @transform_5(%arg0: i32, %arg1: i32) -> (i32, i32) {
    %c0_i32 = arith.constant 0 : i32
    %c0_i32_0 = arith.constant 0 : i32
    %c0_i32_1 = arith.constant 0 : i32
    return %c0_i32, %c0_i32_0 : i32, i32
  }
  func.func @transform_6(%arg0: i32, %arg1: i32) -> (i32, i32) {
    %c0_i32 = arith.constant 0 : i32
    %c0_i32_0 = arith.constant 0 : i32
    %c0_i32_1 = arith.constant 0 : i32
    return %c0_i32, %c0_i32_0 : i32, i32
  }
  func.func @transform_7(%arg0: i32, %arg1: i32) -> (i32, i32) {
    %c0_i32 = arith.constant 0 : i32
    %c0_i32_0 = arith.constant 0 : i32
    %c0_i32_1 = arith.constant 0 : i32
    return %c0_i32, %c0_i32_0 : i32, i32
  }
  func.func @transform_8(%arg0: i32, %arg1: i32) -> (i32, i32) {
    %c0_i32 = arith.constant 0 : i32
    %c0_i32_0 = arith.constant 0 : i32
    %c0_i32_1 = arith.constant 0 : i32
    return %c0_i32, %c0_i32_0 : i32, i32
  }
  func.func @transform_9(%arg0: i32, %arg1: i32) -> (i32, i32) {
    %c0_i32 = arith.constant 0 : i32
    %c0_i32_0 = arith.constant 0 : i32
    %c0_i32_1 = arith.constant 0 : i32
    return %c0_i32, %c0_i32_0 : i32, i32
  }
  func.func @transform_10(%arg0: i32, %arg1: i32) -> (i32, i32) {
    %c0_i32 = arith.constant 0 : i32
    %c0_i32_0 = arith.constant 0 : i32
    %c0_i32_1 = arith.constant 0 : i32
    return %c0_i32, %c0_i32_0 : i32, i32
  }
  func.func @transform_11(%arg0: i32, %arg1: i32) -> (i32, i32, i32) {
    %c0_i32 = arith.constant 0 : i32
    %c0_i32_0 = arith.constant 0 : i32
    %c0_i32_1 = arith.constant 0 : i32
    return %arg0, %c0_i32, %c0_i32_0 : i32, i32, i32
  }
}

</mosaic_0001>

<bundles_post_ra>
// kernel: light_attention_forward.1
= control target key start
LH: loop header
LB: loop body
LE: loop exit
PB: predicated region body
PF: predicated region fallthrough
CT: control target
= control target key end

     0   :  { %s2026_s17 = smov 0   ;;  %s2028_s18 = smov 0   ;;  %s3168_s0 = inlined_call_operand.vmem [shape: f32[2,80,128], index: 0, kind: input, shape index: {}, may-alias: {0,1}]   ;;  %s3169_s1 = inlined_call_operand.vmem [shape: f32[2,80,128], index: 1, kind: input, shape index: {}, may-alias: {0,1}]   ;;  %s3170_s2 = inlined_call_operand.vmem [shape: f32[9,128,256], index: 2, kind: input, shape index: {}]   ;;  %s3171_s3 = inlined_call_operand.vmem [shape: f32[1,256], index: 3, kind: input, shape index: {}]   ;;  %s3172_s4 = inlined_call_operand.vmem [shape: f32[128,32], index: 4, kind: input, shape index: {}]   ;;  %s3173_s5 = inlined_call_operand.vmem [shape: f32[128,32], index: 5, kind: input, shape index: {}]   ;;  %s3174_s6 = inlined_call_operand.vmem [shape: f32[1,32], index: 6, kind: input, shape index: {}]   ;;  %s3175_s7 = inlined_call_operand.vmem [shape: f32[1,32], index: 7, kind: input, shape index: {}]   ;;  %s3176_s8 = inlined_call_operand.vmem [shape: f32[1,32], index: 8, kind: input, shape index: {}]   ;;  %s3177_s9 = inlined_call_operand.vmem [shape: f32[32,128], index: 9, kind: input, shape index: {}]   ;;  %s3178_s10 = inlined_call_operand.vmem [shape: f32[1,128], index: 10, kind: input, shape index: {}]   ;;  %s3179_s11 = inlined_call_operand.vmem [shape: f32[2,8,128], index: 11, kind: output, shape index: {}]  }
   0x1   :  { %s2030_s19 = smov 0   ;;  %s2032_s20 = smov 0  }
   0x2   :  { %s2034_s21 = smov 0  }
   0x3 LB: > { %3183 = sst [smem:[#allocation6_spill]] %s1954_s19  ;;  %s30_s22 = sadd.s32 1, %s1954_s19  ;;  %s1962_s21 = sphi %s2034_s21, %s21_s21   ;;  %s1958_s20 = sphi %s2032_s20, %s3192_s20   ;;  %s1954_s19 = sphi %s2030_s19, %s3191_s19   ;;  %s1950_s18 = sphi %s2028_s18, %s3190_s18   ;;  %s1946_s17 = sphi %s2026_s17, %s3189_s17  }
   0x4   : > { %3184 = sst [smem:[#allocation7_spill]] %s1958_s20  ;;  %s33_s23 = sadd.s32 1, %s1958_s20 }
   0x5   : > { %3185 = sst [smem:[#allocation8_spill]] %s1962_s21  ;;  %p31_p0 = scmp.ge.s32.totalorder %s30_s22, 4 }
   0x6   : > { %p1571_p1 = scmp.ge.s32.totalorder %s1962_s21, 1  ;;  %p377_p2 = scmp.lt.s32.totalorder %s1962_s21, 9 }
   0x7   : > { %s3194_s22 = smov (%p31_p0, %s30_s22), 0  ;;  %s3196_s23 = smov (!%p31_p0, %s33_s23), %s1958_s20 }
   0x8   : > { %3186 = sst [smem:[#allocation9_spill]] %s3194_s22  ;;  %p378_p3 = pnand %p1571_p1, %p377_p2 }
   0x9   : > { %p35_p4 = scmp.ge.s32.totalorder %s3196_s23, 2  ;;  %s1572_s24 = sshll.u32 (!%p378_p3), %s1946_s17, 1 }
   0xa   : > { %381 = sbr.rel (%p378_p3) target bundleno = 701 (0x2bd), region = 64  ;;  %p431_p5 = scmp.lt.s32.totalorder (!%p378_p3), %s1950_s18, 1 }
   0xb   : > { %s3198_s23 = smov (%p35_p4, %s3196_s23), 0  ;;  %p433_p6 = scmp.lt.s32.totalorder (!%p378_p3), %s1572_s24, 9 }
   0xc   : > { %3187 = sst [smem:[#allocation10_spill]] %s3198_s23  ;;  %s1840_s25 = sadd.s32 (!%p378_p3), 2, %s1572_s24 }
   0xd   : > { %p444_p7 = scmp.lt.s32.totalorder (!%p378_p3), %s1840_s25, 9  ;;  %p1577_p8 = scmp.ne.s32.totalorder (!%p378_p3), %s1946_s17, 0 }
   0xf   : > { %s3200_s18 = smov (!%p431_p5, %s1950_s18), 1  ;;  %s3202_s24 = smov (!%p433_p6, %s1572_s24), 9 }
  0x10   : > { %s1873_s26 = smul.u32 10, %s3200_s18  ;;  %s1576_s27 = sshll.u32 %s3200_s18, 3 }
  0x11   : > { %s2062_s12 = scalar_lea.vmem %s3179_s11, %s1576_s27  ;;  %s3204_s25 = smov (!%p444_p7, %s1840_s25), 9 }
  0x12   : > { %s436_s28 = sadd.s32 %s1873_s26, %s3202_s24  ;;  %s447_s23 = sadd.s32 %s1873_s26, %s3204_s25 }
  0x13   : > { %s1573_s13 = sshll.u32 %s436_s28, 3  ;;  %s1575_s22 = sshll.u32 %s447_s23, 3 }
  0x14   : > { %s2067_s16 = scalar_lea.vmem %s3168_s0, %s1573_s13  ;;  %s2072_s21 = scalar_lea.vmem %s3169_s1, %s1575_s22 }
  0x15   : > { %459 = sbr.rel (%p1577_p8) target bundleno = 31 (0x1f), region = 68 }
  0x1a   : > { %v1964_v0 = vmov -inf   ;;  %v1965_v1 = vmov 0.0  }
  0x1b   : > { %460 = vst [vmem:[#allocation2] sm:$0x1] %v1964_v0 }
  0x1c   : > { %463 = vst [vmem:[#allocation5] sm:$0x1] %v1964_v0 }
  0x1d   : > { %461 = vst [vmem:[#allocation3] sm:$0x1] %v1965_v1 }
  0x1e   : > { %462 = vst [vmem:[#allocation4] sm:$0x1] %v1965_v1 }
  0x1f PF: > { %v1608_v2 = vld [vmem:[%s3170_s2 + $0x1f0] sm:$0xff]  ;;  %v1609_v3 = vld [vmem:[%s3170_s2 + $0x1f8] sm:$0xff]  ;;  %v1606_v6 = vld [vmem:[%s3170_s2 + $0x1e0] sm:$0xff]  ;;  %vm535_vm0 = vcmask 1046528   ;;  %vm759_vm1 = vcmask 1044480   ;;  %vm668_vm2 = vcmask 1045504  }
  0x20   : > { %v497_v4 = vld [vmem:[%s3170_s2 + $0xf0] sm:$0xff]  ;;  %543 = vmatpush.msra.mxu0 %v1608_v2  ;;  %566 = vmatpush.msra.mxu1 %v1609_v3  ;;  %v498_v5 = vld [vmem:[%s3170_s2 + $0xf8] sm:$0xff]  ;;  %v1607_v7 = vld [vmem:[%s3170_s2 + $0x1e8] sm:$0xff]  ;;  %vm850_vm3 = vcmask 1043456   ;;  %vm941_vm4 = vcmask 1042432   ;;  %vm1032_vm5 = vcmask 1041408  }
  0x21   : > { %589 = vmatpush.msra.mxu2 %v497_v4  ;;  %612 = vmatpush.msra.mxu3 %v498_v5  ;;  %v495_v8 = vld [vmem:[%s3170_s2 + $0xe0] sm:$0xff]  ;;  %v496_v9 = vld [vmem:[%s3170_s2 + $0xe8] sm:$0xff]  ;;  %v1604_v10 = vld [vmem:[%s3170_s2 + $0x1d0] sm:$0xff]  ;;  %vm1123_vm6 = vcmask 1040384   ;;  %s1834_s28 = sshll.u32 %s1946_s17, 4  ;;  %p1835_p9 = scmp.ne.s32.totalorder %s1946_s17, 3 }
  0x22   : > { %544 = vmatpush.msra.mxu0 %v1606_v6  ;;  %567 = vmatpush.msra.mxu1 %v1607_v7  ;;  %v1605_v11 = vld [vmem:[%s3170_s2 + $0x1d8] sm:$0xff]  ;;  %v493_v12 = vld [vmem:[%s3170_s2 + $0xd0] sm:$0xff]  ;;  %v1602_v14 = vld [vmem:[%s3170_s2 + $0x1c0] sm:$0xff] }
  0x23   : > { %v494_v13 = vld [vmem:[%s3170_s2 + $0xd8] sm:$0xff]  ;;  %590 = vmatpush.msra.mxu2 %v495_v8  ;;  %613 = vmatpush.msra.mxu3 %v496_v9  ;;  %v1603_v15 = vld [vmem:[%s3170_s2 + $0x1c8] sm:$0xff]  ;;  %v491_v16 = vld [vmem:[%s3170_s2 + $0xc0] sm:$0xff] }
  0x24   : > { %545 = vmatpush.msra.mxu0 %v1604_v10  ;;  %568 = vmatpush.msra.mxu1 %v1605_v11  ;;  %v492_v17 = vld [vmem:[%s3170_s2 + $0xc8] sm:$0xff]  ;;  %v1600_v18 = vld [vmem:[%s3170_s2 + $0x1b0] sm:$0xff]  ;;  %v1601_v19 = vld [vmem:[%s3170_s2 + $0x1b8] sm:$0xff] }
  0x25   : > { %591 = vmatpush.msra.mxu2 %v493_v12  ;;  %614 = vmatpush.msra.mxu3 %v494_v13  ;;  %v489_v20 = vld [vmem:[%s3170_s2 + $0xb0] sm:$0xff]  ;;  %v490_v21 = vld [vmem:[%s3170_s2 + $0xb8] sm:$0xff]  ;;  %v1598_v22 = vld [vmem:[%s3170_s2 + $0x1a0] sm:$0xff] }
  0x26   : > { %546 = vmatpush.msra.mxu0 %v1602_v14  ;;  %569 = vmatpush.msra.mxu1 %v1603_v15  ;;  %v1599_v23 = vld [vmem:[%s3170_s2 + $0x1a8] sm:$0xff]  ;;  %v487_v24 = vld [vmem:[%s3170_s2 + $0xa0] sm:$0xff]  ;;  %v1596_v26 = vld [vmem:[%s3170_s2 + $0x190] sm:$0xff] }
  0x27   : > { %592 = vmatpush.msra.mxu2 %v491_v16  ;;  %615 = vmatpush.msra.mxu3 %v492_v17  ;;  %v488_v25 = vld [vmem:[%s3170_s2 + $0xa8] sm:$0xff]  ;;  %v1597_v27 = vld [vmem:[%s3170_s2 + $0x198] sm:$0xff]  ;;  %v485_v28 = vld [vmem:[%s3170_s2 + $0x90] sm:$0xff] }
  0x28   : > { %547 = vmatpush.msra.mxu0 %v1600_v18  ;;  %570 = vmatpush.msra.mxu1 %v1601_v19  ;;  %v486_v29 = vld [vmem:[%s3170_s2 + $0x98] sm:$0xff]  ;;  %v1594_v30 = vld [vmem:[%s3170_s2 + $0x180] sm:$0xff]  ;;  %v1595_v31 = vld [vmem:[%s3170_s2 + $0x188] sm:$0xff] }
  0x29   : > { %593 = vmatpush.msra.mxu2 %v489_v20  ;;  %616 = vmatpush.msra.mxu3 %v490_v21  ;;  %v483_v32 = vld [vmem:[%s3170_s2 + $0x80] sm:$0xff]  ;;  %v484_v33 = vld [vmem:[%s3170_s2 + $0x88] sm:$0xff]  ;;  %v1592_v34 = vld [vmem:[%s3170_s2 + $0x170] sm:$0xff] }
  0x2a   : > { %548 = vmatpush.msra.mxu0 %v1598_v22  ;;  %571 = vmatpush.msra.mxu1 %v1599_v23  ;;  %v1593_v35 = vld [vmem:[%s3170_s2 + $0x178] sm:$0xff]  ;;  %v481_v36 = vld [vmem:[%s3170_s2 + $0x70] sm:$0xff]  ;;  %v1590_v38 = vld [vmem:[%s3170_s2 + $0x160] sm:$0xff] }
  0x2b   : > { %594 = vmatpush.msra.mxu2 %v487_v24  ;;  %617 = vmatpush.msra.mxu3 %v488_v25  ;;  %v482_v37 = vld [vmem:[%s3170_s2 + $0x78] sm:$0xff]  ;;  %v1591_v39 = vld [vmem:[%s3170_s2 + $0x168] sm:$0xff]  ;;  %v479_v40 = vld [vmem:[%s3170_s2 + $0x60] sm:$0xff] }
  0x2c   : > { %549 = vmatpush.msra.mxu0 %v1596_v26  ;;  %572 = vmatpush.msra.mxu1 %v1597_v27  ;;  %v480_v41 = vld [vmem:[%s3170_s2 + $0x68] sm:$0xff]  ;;  %v1588_v42 = vld [vmem:[%s3170_s2 + $0x150] sm:$0xff]  ;;  %v1589_v43 = vld [vmem:[%s3170_s2 + $0x158] sm:$0xff] }
  0x2d   : > { %595 = vmatpush.msra.mxu2 %v485_v28  ;;  %618 = vmatpush.msra.mxu3 %v486_v29  ;;  %v477_v44 = vld [vmem:[%s3170_s2 + $0x50] sm:$0xff]  ;;  %v478_v45 = vld [vmem:[%s3170_s2 + $0x58] sm:$0xff]  ;;  %v1586_v46 = vld [vmem:[%s3170_s2 + $0x140] sm:$0xff] }
  0x2e   : > { %550 = vmatpush.msra.mxu0 %v1594_v30  ;;  %573 = vmatpush.msra.mxu1 %v1595_v31  ;;  %v1587_v47 = vld [vmem:[%s3170_s2 + $0x148] sm:$0xff]  ;;  %v475_v48 = vld [vmem:[%s3170_s2 + $0x40] sm:$0xff]  ;;  %v1584_v50 = vld [vmem:[%s3170_s2 + $0x130] sm:$0xff] }
  0x2f   : > { %596 = vmatpush.msra.mxu2 %v483_v32  ;;  %619 = vmatpush.msra.mxu3 %v484_v33  ;;  %v476_v49 = vld [vmem:[%s3170_s2 + $0x48] sm:$0xff]  ;;  %v1585_v51 = vld [vmem:[%s3170_s2 + $0x138] sm:$0xff]  ;;  %v473_v52 = vld [vmem:[%s3170_s2 + $0x30] sm:$0xff] }
  0x30   : > { %551 = vmatpush.msra.mxu0 %v1592_v34  ;;  %574 = vmatpush.msra.mxu1 %v1593_v35  ;;  %v474_v53 = vld [vmem:[%s3170_s2 + $0x38] sm:$0xff]  ;;  %v1582_v54 = vld [vmem:[%s3170_s2 + $0x120] sm:$0xff]  ;;  %v1583_v55 = vld [vmem:[%s3170_s2 + $0x128] sm:$0xff] }
  0x31   : > { %597 = vmatpush.msra.mxu2 %v481_v36  ;;  %620 = vmatpush.msra.mxu3 %v482_v37  ;;  %v471_v56 = vld [vmem:[%s3170_s2 + $0x20] sm:$0xff]  ;;  %v472_v57 = vld [vmem:[%s3170_s2 + $0x28] sm:$0xff]  ;;  %v1580_v58 = vld [vmem:[%s3170_s2 + $0x110] sm:$0xff] }
  0x32   : > { %552 = vmatpush.msra.mxu0 %v1590_v38  ;;  %575 = vmatpush.msra.mxu1 %v1591_v39  ;;  %v1581_v59 = vld [vmem:[%s3170_s2 + $0x118] sm:$0xff]  ;;  %v469_v60 = vld [vmem:[%s3170_s2 + $0x10] sm:$0xff]  ;;  %v1578_v62 = vld [vmem:[%s3170_s2 + $0x100] sm:$0xff] }
  0x33   : > { %598 = vmatpush.msra.mxu2 %v479_v40  ;;  %621 = vmatpush.msra.mxu3 %v480_v41  ;;  %v470_v61 = vld [vmem:[%s3170_s2 + $0x18] sm:$0xff]  ;;  %v1579_v63 = vld [vmem:[%s3170_s2 + $0x108] sm:$0xff]  ;;  %v467_v0 = vld [vmem:[%s3170_s2] sm:$0xff] }
  0x34   : > { %553 = vmatpush.msra.mxu0 %v1588_v42  ;;  %576 = vmatpush.msra.mxu1 %v1589_v43  ;;  %v468_v1 = vld [vmem:[%s3170_s2 + $0x8] sm:$0xff]  ;;  %v1640_v2 = vld [vmem:[%s3170_s2 + $0x2f0] sm:$0xff]  ;;  %v1641_v3 = vld [vmem:[%s3170_s2 + $0x2f8] sm:$0xff] }
  0x35   : > { %599 = vmatpush.msra.mxu2 %v477_v44  ;;  %622 = vmatpush.msra.mxu3 %v478_v45  ;;  %v1672_v4 = vld [vmem:[%s3170_s2 + $0x3f0] sm:$0xff]  ;;  %v1673_v5 = vld [vmem:[%s3170_s2 + $0x3f8] sm:$0xff]  ;;  %v1638_v6 = vld [vmem:[%s3170_s2 + $0x2e0] sm:$0xff] }
  0x36   : > { %554 = vmatpush.msra.mxu0 %v1586_v46  ;;  %577 = vmatpush.msra.mxu1 %v1587_v47  ;;  %v1639_v7 = vld [vmem:[%s3170_s2 + $0x2e8] sm:$0xff]  ;;  %v1670_v8 = vld [vmem:[%s3170_s2 + $0x3e0] sm:$0xff]  ;;  %v1636_v10 = vld [vmem:[%s3170_s2 + $0x2d0] sm:$0xff] }
  0x37   : > { %600 = vmatpush.msra.mxu2 %v475_v48  ;;  %623 = vmatpush.msra.mxu3 %v476_v49  ;;  %v1671_v9 = vld [vmem:[%s3170_s2 + $0x3e8] sm:$0xff]  ;;  %v1637_v11 = vld [vmem:[%s3170_s2 + $0x2d8] sm:$0xff]  ;;  %v1668_v12 = vld [vmem:[%s3170_s2 + $0x3d0] sm:$0xff] }
  0x38   : > { %555 = vmatpush.msra.mxu0 %v1584_v50  ;;  %578 = vmatpush.msra.mxu1 %v1585_v51  ;;  %v1669_v13 = vld [vmem:[%s3170_s2 + $0x3d8] sm:$0xff]  ;;  %v1634_v14 = vld [vmem:[%s3170_s2 + $0x2c0] sm:$0xff]  ;;  %v1635_v15 = vld [vmem:[%s3170_s2 + $0x2c8] sm:$0xff] }
  0x39   : > { %601 = vmatpush.msra.mxu2 %v473_v52  ;;  %624 = vmatpush.msra.mxu3 %v474_v53  ;;  %v1666_v16 = vld [vmem:[%s3170_s2 + $0x3c0] sm:$0xff]  ;;  %v1667_v17 = vld [vmem:[%s3170_s2 + $0x3c8] sm:$0xff]  ;;  %v1632_v18 = vld [vmem:[%s3170_s2 + $0x2b0] sm:$0xff] }
  0x3a   : > { %556 = vmatpush.msra.mxu0 %v1582_v54  ;;  %579 = vmatpush.msra.mxu1 %v1583_v55  ;;  %v1633_v19 = vld [vmem:[%s3170_s2 + $0x2b8] sm:$0xff]  ;;  %v1664_v20 = vld [vmem:[%s3170_s2 + $0x3b0] sm:$0xff]  ;;  %v1630_v22 = vld [vmem:[%s3170_s2 + $0x2a0] sm:$0xff] }
  0x3b   : > { %602 = vmatpush.msra.mxu2 %v471_v56  ;;  %625 = vmatpush.msra.mxu3 %v472_v57  ;;  %v1665_v21 = vld [vmem:[%s3170_s2 + $0x3b8] sm:$0xff]  ;;  %v1631_v23 = vld [vmem:[%s3170_s2 + $0x2a8] sm:$0xff]  ;;  %v1662_v24 = vld [vmem:[%s3170_s2 + $0x3a0] sm:$0xff] }
  0x3c   : > { %557 = vmatpush.msra.mxu0 %v1580_v58  ;;  %580 = vmatpush.msra.mxu1 %v1581_v59  ;;  %v1663_v25 = vld [vmem:[%s3170_s2 + $0x3a8] sm:$0xff]  ;;  %v1628_v26 = vld [vmem:[%s3170_s2 + $0x290] sm:$0xff]  ;;  %v1629_v27 = vld [vmem:[%s3170_s2 + $0x298] sm:$0xff] }
  0x3d   : > { %603 = vmatpush.msra.mxu2 %v469_v60  ;;  %626 = vmatpush.msra.mxu3 %v470_v61  ;;  %v1660_v28 = vld [vmem:[%s3170_s2 + $0x390] sm:$0xff]  ;;  %v1661_v29 = vld [vmem:[%s3170_s2 + $0x398] sm:$0xff]  ;;  %v1626_v30 = vld [vmem:[%s3170_s2 + $0x280] sm:$0xff] }
  0x3e   : > { %558 = vmatpush.msra.mxu0 %v1578_v62  ;;  %581 = vmatpush.msra.mxu1 %v1579_v63  ;;  %v1627_v31 = vld [vmem:[%s3170_s2 + $0x288] sm:$0xff]  ;;  %v1658_v32 = vld [vmem:[%s3170_s2 + $0x380] sm:$0xff]  ;;  %v1624_v34 = vld [vmem:[%s3170_s2 + $0x270] sm:$0xff] }
  0x3f   : > { %604 = vmatpush.msra.mxu2 %v467_v0  ;;  %627 = vmatpush.msra.mxu3 %v468_v1  ;;  %v1659_v33 = vld [vmem:[%s3170_s2 + $0x388] sm:$0xff]  ;;  %v1625_v35 = vld [vmem:[%s3170_s2 + $0x278] sm:$0xff]  ;;  %v1656_v36 = vld [vmem:[%s3170_s2 + $0x370] sm:$0xff] }
  0x40   : > { %676 = vmatpush.msrb.mxu0 %v1640_v2  ;;  %699 = vmatpush.msrb.mxu1 %v1641_v3  ;;  %v1657_v37 = vld [vmem:[%s3170_s2 + $0x378] sm:$0xff]  ;;  %v2376_v38 = vld [vmem:[%s2067_s16] sm:$0xff]  ;;  %v2379_v39 = vld [vmem:[%s2067_s16 + $0x8] sm:$0xff] }
  0x41   : > { %767 = vmatpush.msrb.mxu2 %v1672_v4  ;;  %790 = vmatpush.msrb.mxu3 %v1673_v5  ;;  %v1622_v40 = vld [vmem:[%s3170_s2 + $0x260] sm:$0xff]  ;;  %v1623_v41 = vld [vmem:[%s3170_s2 + $0x268] sm:$0xff]  ;;  %v1620_v44 = vld [vmem:[%s3170_s2 + $0x250] sm:$0xff]  ;;  %v536_v45 = vrot.slane %v2376_v38, 1  ;;  %v537_v46 = vrot.slane %v2379_v39, 1 }
  0x42   : > { %677 = vmatpush.msrb.mxu0 %v1638_v6  ;;  %700 = vmatpush.msrb.mxu1 %v1639_v7  ;;  %v1654_v42 = vld [vmem:[%s3170_s2 + $0x360] sm:$0xff]  ;;  %v1655_v43 = vld [vmem:[%s3170_s2 + $0x368] sm:$0xff]  ;;  %v1621_v47 = vld [vmem:[%s3170_s2 + $0x258] sm:$0xff] }
  0x43   : > { %768 = vmatpush.msrb.mxu2 %v1670_v8  ;;  %791 = vmatpush.msrb.mxu3 %v1671_v9  ;;  %v1652_v48 = vld [vmem:[%s3170_s2 + $0x350] sm:$0xff]  ;;  %v1653_v49 = vld [vmem:[%s3170_s2 + $0x358] sm:$0xff]  ;;  %v1618_v50 = vld [vmem:[%s3170_s2 + $0x240] sm:$0xff]  ;;  %v538_v54 = vsel %vm535_vm0, %v536_v45, %v537_v46 }
  0x44   : > { %678 = vmatpush.msrb.mxu0 %v1636_v10  ;;  %701 = vmatpush.msrb.mxu1 %v1637_v11  ;;  %v1619_v51 = vld [vmem:[%s3170_s2 + $0x248] sm:$0xff]  ;;  %v1650_v52 = vld [vmem:[%s3170_s2 + $0x340] sm:$0xff]  ;;  %v1616_v55 = vld [vmem:[%s3170_s2 + $0x230] sm:$0xff] }
  0x45   : > { %769 = vmatpush.msrb.mxu2 %v1668_v12  ;;  %792 = vmatpush.msrb.mxu3 %v1669_v13  ;;  %v1651_v53 = vld [vmem:[%s3170_s2 + $0x348] sm:$0xff]  ;;  %v1617_v56 = vld [vmem:[%s3170_s2 + $0x238] sm:$0xff]  ;;  %v1648_v57 = vld [vmem:[%s3170_s2 + $0x330] sm:$0xff]  ;;  %v760_v12 = vrot.slane %v2376_v38, 3  ;;  %v761_v13 = vrot.slane %v2379_v39, 3 }
  0x46   : > { %679 = vmatpush.msrb.mxu0 %v1634_v14  ;;  %702 = vmatpush.msrb.mxu1 %v1635_v15  ;;  %v1649_v58 = vld [vmem:[%s3170_s2 + $0x338] sm:$0xff]  ;;  %v1614_v59 = vld [vmem:[%s3170_s2 + $0x220] sm:$0xff]  ;;  %v1615_v60 = vld [vmem:[%s3170_s2 + $0x228] sm:$0xff] }
  0x47   : > { %770 = vmatpush.msrb.mxu2 %v1666_v16  ;;  %793 = vmatpush.msrb.mxu3 %v1667_v17  ;;  %v2440_v61 = vld [vmem:[%s2072_s21] sm:$0xff]  ;;  %v1647_v63 = vld [vmem:[%s3170_s2 + $0x328] sm:$0xff]  ;;  %v1612_v0 = vld [vmem:[%s3170_s2 + $0x210] sm:$0xff] }
  0x48   : > { %680 = vmatpush.msrb.mxu0 %v1632_v18  ;;  %703 = vmatpush.msrb.mxu1 %v1633_v19  ;;  %v1646_v62 = vld [vmem:[%s3170_s2 + $0x320] sm:$0xff]  ;;  %v1613_v1 = vld [vmem:[%s3170_s2 + $0x218] sm:$0xff]  ;;  %v1644_v2 = vld [vmem:[%s3170_s2 + $0x310] sm:$0xff]  ;;  %v539_v3 = vrot.slane %v2440_v61, 1 }
  0x49   : > { %771 = vmatpush.msrb.mxu2 %v1664_v20  ;;  %794 = vmatpush.msrb.mxu3 %v1665_v21  ;;  %v1645_v4 = vld [vmem:[%s3170_s2 + $0x318] sm:$0xff]  ;;  %v1610_v5 = vld [vmem:[%s3170_s2 + $0x200] sm:$0xff]  ;;  %v1611_v6 = vld [vmem:[%s3170_s2 + $0x208] sm:$0xff]  ;;  %v2508_v20 = vsel %vm759_vm1, %v760_v12, %v761_v13 }
  0x4a   : > { %681 = vmatpush.msrb.mxu0 %v1630_v22  ;;  %704 = vmatpush.msrb.mxu1 %v1631_v23  ;;  %v1642_v7 = vld [vmem:[%s3170_s2 + $0x300] sm:$0xff]  ;;  %v1643_v8 = vld [vmem:[%s3170_s2 + $0x308] sm:$0xff]  ;;  %v2475_v9 = vsel %vm535_vm0, %v537_v46, %v539_v3  ;;  %v1704_v10 = vld [vmem:[%s3170_s2 + $0x4f0] sm:$0xff]  ;;  %v669_v22 = vrot.slane %v2376_v38, 2  ;;  %v670_v23 = vrot.slane %v2379_v39, 2 }
  0x4b   : > { %772 = vmatpush.msrb.mxu2 %v1662_v24  ;;  %795 = vmatpush.msrb.mxu3 %v1663_v25  ;;  %v1705_v11 = vld [vmem:[%s3170_s2 + $0x4f8] sm:$0xff]  ;;  %v1736_v14 = vld [vmem:[%s3170_s2 + $0x5f0] sm:$0xff]  ;;  %v1702_v16 = vld [vmem:[%s3170_s2 + $0x4e0] sm:$0xff] }
  0x4c   : > { %682 = vmatpush.msrb.mxu0 %v1628_v26  ;;  %705 = vmatpush.msrb.mxu1 %v1629_v27  ;;  %v1737_v15 = vld [vmem:[%s3170_s2 + $0x5f8] sm:$0xff]  ;;  %v1703_v17 = vld [vmem:[%s3170_s2 + $0x4e8] sm:$0xff]  ;;  %v1734_v18 = vld [vmem:[%s3170_s2 + $0x5e0] sm:$0xff] }
  0x4d   : > { %773 = vmatpush.msrb.mxu2 %v1660_v28  ;;  %796 = vmatpush.msrb.mxu3 %v1661_v29  ;;  %v1735_v19 = vld [vmem:[%s3170_s2 + $0x5e8] sm:$0xff]  ;;  %v1700_v21 = vld [vmem:[%s3170_s2 + $0x4d0] sm:$0xff]  ;;  %v1701_v24 = vld [vmem:[%s3170_s2 + $0x4d8] sm:$0xff] }
  0x4e   : > { %683 = vmatpush.msrb.mxu0 %v1626_v30  ;;  %706 = vmatpush.msrb.mxu1 %v1627_v31  ;;  %v1732_v25 = vld [vmem:[%s3170_s2 + $0x5d0] sm:$0xff]  ;;  %v1733_v26 = vld [vmem:[%s3170_s2 + $0x5d8] sm:$0xff]  ;;  %v1698_v27 = vld [vmem:[%s3170_s2 + $0x4c0] sm:$0xff]  ;;  %v2540_v31 = vsel %vm668_vm2, %v669_v22, %v670_v23  ;;  %v943_v22 = vrot.slane %v2379_v39, 5 }
  0x4f   : > { %774 = vmatpush.msrb.mxu2 %v1658_v32  ;;  %797 = vmatpush.msrb.mxu3 %v1659_v33  ;;  %v1699_v28 = vld [vmem:[%s3170_s2 + $0x4c8] sm:$0xff]  ;;  %v1730_v29 = vld [vmem:[%s3170_s2 + $0x5c0] sm:$0xff]  ;;  %v1696_v32 = vld [vmem:[%s3170_s2 + $0x4b0] sm:$0xff] }
  0x50   : > { %684 = vmatpush.msrb.mxu0 %v1624_v34  ;;  %707 = vmatpush.msrb.mxu1 %v1625_v35  ;;  %v1731_v30 = vld [vmem:[%s3170_s2 + $0x5c8] sm:$0xff]  ;;  %v1697_v33 = vld [vmem:[%s3170_s2 + $0x4b8] sm:$0xff]  ;;  %v1728_v34 = vld [vmem:[%s3170_s2 + $0x5b0] sm:$0xff] }
  0x51   : > { %775 = vmatpush.msrb.mxu2 %v1656_v36  ;;  %798 = vmatpush.msrb.mxu3 %v1657_v37  ;;  %v1729_v35 = vld [vmem:[%s3170_s2 + $0x5b8] sm:$0xff]  ;;  %v1694_v36 = vld [vmem:[%s3170_s2 + $0x4a0] sm:$0xff]  ;;  %v1695_v37 = vld [vmem:[%s3170_s2 + $0x4a8] sm:$0xff] }
  0x52   : > { %685 = vmatpush.msrb.mxu0 %v1622_v40  ;;  %708 = vmatpush.msrb.mxu1 %v1623_v41  ;;  %v1726_v40 = vld [vmem:[%s3170_s2 + $0x5a0] sm:$0xff]  ;;  %v1727_v41 = vld [vmem:[%s3170_s2 + $0x5a8] sm:$0xff]  ;;  %v1725_v45 = vld [vmem:[%s3170_s2 + $0x598] sm:$0xff] }
  0x53   : > { %776 = vmatpush.msrb.mxu2 %v1654_v42  ;;  %799 = vmatpush.msrb.mxu3 %v1655_v43  ;;  %v1692_v42 = vld [vmem:[%s3170_s2 + $0x490] sm:$0xff]  ;;  %v1693_v43 = vld [vmem:[%s3170_s2 + $0x498] sm:$0xff]  ;;  %v1690_v46 = vld [vmem:[%s3170_s2 + $0x480] sm:$0xff] }
  0x54   : > { %628 = vmatmul.f32.vlgmr.msra.gmra.mxu3 %v2376_v38  ;;  %686 = vmatpush.msrb.mxu0 %v1620_v44  ;;  %v1724_v44 = vld [vmem:[%s3170_s2 + $0x590] sm:$0xff]  ;;  %v1714_v3 = vld [vmem:[%s3170_s2 + $0x540] sm:$0xff]  ;;  %v1679_v12 = vld [vmem:[%s3170_s2 + $0x428] sm:$0xff] }
  0x55   : > { %709 = vmatpush.msrb.mxu1 %v1621_v47  ;;  %777 = vmatpush.msrb.mxu2 %v1652_v48  ;;  %v1691_v47 = vld [vmem:[%s3170_s2 + $0x488] sm:$0xff]  ;;  %v1722_v48 = vld [vmem:[%s3170_s2 + $0x580] sm:$0xff] }
  0x56   : > { %800 = vmatpush.msrb.mxu3 %v1653_v49  ;;  %687 = vmatpush.msrb.mxu0 %v1618_v50  ;;  %v1723_v49 = vld [vmem:[%s3170_s2 + $0x588] sm:$0xff]  ;;  %v1688_v50 = vld [vmem:[%s3170_s2 + $0x470] sm:$0xff] }
  0x57   : > { %710 = vmatpush.msrb.mxu1 %v1619_v51  ;;  %778 = vmatpush.msrb.mxu2 %v1650_v52  ;;  %v1689_v51 = vld [vmem:[%s3170_s2 + $0x478] sm:$0xff]  ;;  %v1720_v52 = vld [vmem:[%s3170_s2 + $0x570] sm:$0xff] }
  0x58   : > { %801 = vmatpush.msrb.mxu3 %v1651_v53  ;;  %582 = vmatmul.f32.vlgmr.msra.gmra.mxu1 %v538_v54  ;;  %v1721_v53 = vld [vmem:[%s3170_s2 + $0x578] sm:$0xff] }
  0x59   : > { %688 = vmatpush.msrb.mxu0 %v1616_v55  ;;  %711 = vmatpush.msrb.mxu1 %v1617_v56  ;;  %v1687_v55 = vld [vmem:[%s3170_s2 + $0x468] sm:$0xff]  ;;  %v1718_v56 = vld [vmem:[%s3170_s2 + $0x560] sm:$0xff] }
  0x5a   : > { %779 = vmatpush.msrb.mxu2 %v1648_v57  ;;  %802 = vmatpush.msrb.mxu3 %v1649_v58  ;;  %v1719_v57 = vld [vmem:[%s3170_s2 + $0x568] sm:$0xff]  ;;  %v1684_v58 = vld [vmem:[%s3170_s2 + $0x450] sm:$0xff] }
  0x5b   : > { %689 = vmatpush.msrb.mxu0 %v1614_v59  ;;  %712 = vmatpush.msrb.mxu1 %v1615_v60  ;;  %v1685_v59 = vld [vmem:[%s3170_s2 + $0x458] sm:$0xff]  ;;  %v672_v60 = vrot.slane %v2440_v61, 2 }
  0x5c   : > { %780 = vmatpush.msrb.mxu2 %v1646_v62  ;;  %803 = vmatpush.msrb.mxu3 %v1647_v63  ;;  %v1716_v62 = vld [vmem:[%s3170_s2 + $0x550] sm:$0xff]  ;;  %v1717_v63 = vld [vmem:[%s3170_s2 + $0x558] sm:$0xff] }
  0x5d   : > { %631 = vmatmul.f32.gmra.mxu3 %v2379_v39  ;;  %690 = vmatpush.msrb.mxu0 %v1612_v0  ;;  %v763_v0 = vrot.slane %v2440_v61, 3 }
  0x5e   : > { %713 = vmatpush.msrb.mxu1 %v1613_v1  ;;  %781 = vmatpush.msrb.mxu2 %v1644_v2  ;;  %v1682_v1 = vld [vmem:[%s3170_s2 + $0x440] sm:$0xff]  ;;  %v1683_v2 = vld [vmem:[%s3170_s2 + $0x448] sm:$0xff] }
  0x5f   : > { %804 = vmatpush.msrb.mxu3 %v1645_v4  ;;  %691 = vmatpush.msrb.mxu0 %v1610_v5  ;;  %v1715_v4 = vld [vmem:[%s3170_s2 + $0x548] sm:$0xff]  ;;  %v2646_v5 = vsel %vm668_vm2, %v670_v23, %v672_v60  ;;  %v1674_v23 = vld [vmem:[%s3170_s2 + $0x400] sm:$0xff]  ;;  %v1757_v60 = vld [vmem:[%s3170_s2 + $0x698] sm:$0xff] }
  0x60   : > { %714 = vmatpush.msrb.mxu1 %v1611_v6  ;;  %782 = vmatpush.msrb.mxu2 %v1642_v7  ;;  %v764_v6 = vsel %vm759_vm1, %v761_v13, %v763_v0  ;;  %v1680_v7 = vld [vmem:[%s3170_s2 + $0x430] sm:$0xff]  ;;  %v1710_v13 = vld [vmem:[%s3170_s2 + $0x520] sm:$0xff] }
  0x61   : > { %805 = vmatpush.msrb.mxu3 %v1643_v8  ;;  %559 = vmatmul.f32.vlgmr.msra.gmra.mxu0 %v538_v54  ;;  %v1686_v54 = vld [vmem:[%s3170_s2 + $0x460] sm:$0xff]  ;;  %v1681_v8 = vld [vmem:[%s3170_s2 + $0x438] sm:$0xff] }
  0x62   : > { %585 = vmatmul.f32.gmra.mxu1 %v2475_v9  ;;  %605 = vmatmul.f32.vlgmr.msra.gmra.mxu2 %v2376_v38  ;;  %v1754_v0 = vld [vmem:[%s3170_s2 + $0x680] sm:$0xff] }
  0x63   : > { %858 = vmatpush.msra.mxu0 %v1704_v10  ;;  %881 = vmatpush.msra.mxu1 %v1705_v11  ;;  %v1713_v10 = vld [vmem:[%s3170_s2 + $0x538] sm:$0xff]  ;;  %v1678_v11 = vld [vmem:[%s3170_s2 + $0x420] sm:$0xff] }
  0x64   : > { %949 = vmatpush.msra.mxu2 %v1736_v14  ;;  %972 = vmatpush.msra.mxu3 %v1737_v15  ;;  %v1711_v14 = vld [vmem:[%s3170_s2 + $0x528] sm:$0xff]  ;;  %v1676_v15 = vld [vmem:[%s3170_s2 + $0x410] sm:$0xff] }
  0x65   : > { %859 = vmatpush.msra.mxu0 %v1702_v16  ;;  %882 = vmatpush.msra.mxu1 %v1703_v17  ;;  %v1677_v16 = vld [vmem:[%s3170_s2 + $0x418] sm:$0xff]  ;;  %v851_v17 = vrot.slane %v2376_v38, 4 }
  0x66   : > { %950 = vmatpush.msra.mxu2 %v1734_v18  ;;  %973 = vmatpush.msra.mxu3 %v1735_v19  ;;  %v852_v18 = vrot.slane %v2379_v39, 4  ;;  %v1708_v19 = vld [vmem:[%s3170_s2 + $0x510] sm:$0xff] }
  0x67   : > { %806 = vmatmul.f32.vlgmr.msrb.gmra.mxu3 %v2508_v20  ;;  %860 = vmatpush.msra.mxu0 %v1700_v21  ;;  %v942_v21 = vrot.slane %v2376_v38, 5 }
  0x68   : > { %883 = vmatpush.msra.mxu1 %v1701_v24  ;;  %951 = vmatpush.msra.mxu2 %v1732_v25  ;;  %v1675_v24 = vld [vmem:[%s3170_s2 + $0x408] sm:$0xff]  ;;  %v1706_v25 = vld [vmem:[%s3170_s2 + $0x500] sm:$0xff] }
  0x69   : > { %974 = vmatpush.msra.mxu3 %v1733_v26  ;;  %861 = vmatpush.msra.mxu0 %v1698_v27  ;;  %v1707_v26 = vld [vmem:[%s3170_s2 + $0x508] sm:$0xff]  ;;  %v2707_v27 = vsel %vm850_vm3, %v851_v17, %v852_v18 }
  0x6a   : > { %884 = vmatpush.msra.mxu1 %v1699_v28  ;;  %952 = vmatpush.msra.mxu2 %v1730_v29  ;;  %v944_v28 = vsel %vm941_vm4, %v942_v21, %v943_v22  ;;  %v1768_v29 = vld [vmem:[%s3170_s2 + $0x6f0] sm:$0xff]  ;;  %v1747_v17 = vld [vmem:[%s3170_s2 + $0x648] sm:$0xff]  ;;  %v1745_v21 = vld [vmem:[%s3170_s2 + $0x638] sm:$0xff] }
  0x6b   : > { %975 = vmatpush.msra.mxu3 %v1731_v30  ;;  %715 = vmatmul.f32.vlgmr.msrb.gmra.mxu1 %v2540_v31  ;;  %v1769_v30 = vld [vmem:[%s3170_s2 + $0x6f8] sm:$0xff] }
  0x6c   : > { %862 = vmatpush.msra.mxu0 %v1696_v32  ;;  %885 = vmatpush.msra.mxu1 %v1697_v33  ;;  %v1801_v32 = vld [vmem:[%s3170_s2 + $0x7f8] sm:$0xff]  ;;  %v1766_v33 = vld [vmem:[%s3170_s2 + $0x6e0] sm:$0xff] }
  0x6d   : > { %953 = vmatpush.msra.mxu2 %v1728_v34  ;;  %976 = vmatpush.msra.mxu3 %v1729_v35  ;;  %v1767_v34 = vld [vmem:[%s3170_s2 + $0x6e8] sm:$0xff]  ;;  %v1798_v35 = vld [vmem:[%s3170_s2 + $0x7e0] sm:$0xff] }
  0x6e   : > { %863 = vmatpush.msra.mxu0 %v1694_v36  ;;  %886 = vmatpush.msra.mxu1 %v1695_v37  ;;  %v1799_v36 = vld [vmem:[%s3170_s2 + $0x7e8] sm:$0xff]  ;;  %v1764_v37 = vld [vmem:[%s3170_s2 + $0x6d0] sm:$0xff] }
  0x6f   : > { %954 = vmatpush.msra.mxu2 %v1726_v40  ;;  %977 = vmatpush.msra.mxu3 %v1727_v41  ;;  %v1765_v40 = vld [vmem:[%s3170_s2 + $0x6d8] sm:$0xff]  ;;  %v854_v41 = vrot.slane %v2440_v61, 4 }
  0x70   : > { %864 = vmatpush.msra.mxu0 %v1692_v42  ;;  %887 = vmatpush.msra.mxu1 %v1693_v43  ;;  %v1796_v42 = vld [vmem:[%s3170_s2 + $0x7d0] sm:$0xff]  ;;  %v1797_v43 = vld [vmem:[%s3170_s2 + $0x7d8] sm:$0xff] }
  0x71   : > { %955 = vmatpush.msra.mxu2 %v1724_v44  ;;  %978 = vmatpush.msra.mxu3 %v1725_v45  ;;  %v945_v44 = vrot.slane %v2440_v61, 5  ;;  %v1762_v45 = vld [vmem:[%s3170_s2 + $0x6c0] sm:$0xff] }
  0x72   : > { %608 = vmatmul.f32.gmra.mxu2 %v2379_v39  ;;  %865 = vmatpush.msra.mxu0 %v1690_v46  ;;  %v1763_v46 = vld [vmem:[%s3170_s2 + $0x6c8] sm:$0xff] }
  0x73   : > { %888 = vmatpush.msra.mxu1 %v1691_v47  ;;  %956 = vmatpush.msra.mxu2 %v1722_v48  ;;  %v1794_v47 = vld [vmem:[%s3170_s2 + $0x7c0] sm:$0xff]  ;;  %v1795_v48 = vld [vmem:[%s3170_s2 + $0x7c8] sm:$0xff] }
  0x74   : > { %979 = vmatpush.msra.mxu3 %v1723_v49  ;;  %866 = vmatpush.msra.mxu0 %v1688_v50  ;;  %v2763_v49 = vsel %vm850_vm3, %v852_v18, %v854_v41  ;;  %v2766_v50 = vsel %vm941_vm4, %v943_v22, %v945_v44  ;;  %v1778_v18 = vld [vmem:[%s3170_s2 + $0x740] sm:$0xff]  ;;  %v1776_v22 = vld [vmem:[%s3170_s2 + $0x730] sm:$0xff]  ;;  %v1833_v44 = vld [vmem:[%s3170_s2 + $0x8f8] sm:$0xff] }
  0x75   : > { %889 = vmatpush.msra.mxu1 %v1689_v51  ;;  %957 = vmatpush.msra.mxu2 %v1720_v52  ;;  %v1760_v51 = vld [vmem:[%s3170_s2 + $0x6b0] sm:$0xff]  ;;  %v1761_v52 = vld [vmem:[%s3170_s2 + $0x6b8] sm:$0xff] }
  0x76   : > { %980 = vmatpush.msra.mxu3 %v1721_v53  ;;  %562 = vmatmul.f32.gmra.mxu0 %v2475_v9  ;;  %v1712_v9 = vld [vmem:[%s3170_s2 + $0x530] sm:$0xff] }
  0x77   : > { %867 = vmatpush.msra.mxu0 %v1686_v54  ;;  %890 = vmatpush.msra.mxu1 %v1687_v55  ;;  %v1792_v53 = vld [vmem:[%s3170_s2 + $0x7b0] sm:$0xff]  ;;  %v1793_v54 = vld [vmem:[%s3170_s2 + $0x7b8] sm:$0xff]  ;;  %v1758_v55 = vld [vmem:[%s3170_s2 + $0x6a0] sm:$0xff] }
  0x78   : > { %958 = vmatpush.msra.mxu2 %v1718_v56  ;;  %981 = vmatpush.msra.mxu3 %v1719_v57  ;;  %v1759_v56 = vld [vmem:[%s3170_s2 + $0x6a8] sm:$0xff]  ;;  %v1790_v57 = vld [vmem:[%s3170_s2 + $0x7a0] sm:$0xff] }
  0x79   : > { %868 = vmatpush.msra.mxu0 %v1684_v58  ;;  %891 = vmatpush.msra.mxu1 %v1685_v59  ;;  %v1791_v58 = vld [vmem:[%s3170_s2 + $0x7a8] sm:$0xff]  ;;  %v1756_v59 = vld [vmem:[%s3170_s2 + $0x690] sm:$0xff] }
  0x7a   : > { %959 = vmatpush.msra.mxu2 %v1716_v62  ;;  %982 = vmatpush.msra.mxu3 %v1717_v63  ;;  %v1788_v62 = vld [vmem:[%s3170_s2 + $0x790] sm:$0xff]  ;;  %v1789_v63 = vld [vmem:[%s3170_s2 + $0x798] sm:$0xff] }
  0x7b   : > { %783 = vmatmul.f32.vlgmr.msrb.gmra.mxu2 %v2508_v20  ;;  %869 = vmatpush.msra.mxu0 %v1682_v1  ;;  %v1709_v20 = vld [vmem:[%s3170_s2 + $0x518] sm:$0xff]  ;;  %v1755_v1 = vld [vmem:[%s3170_s2 + $0x688] sm:$0xff] }
  0x7c   : > { %892 = vmatpush.msra.mxu1 %v1683_v2  ;;  %960 = vmatpush.msra.mxu2 %v1714_v3  ;;  %v1786_v2 = vld [vmem:[%s3170_s2 + $0x780] sm:$0xff]  ;;  %v1787_v3 = vld [vmem:[%s3170_s2 + $0x788] sm:$0xff] }
  0x7d   : > { %983 = vmatpush.msra.mxu3 %v1715_v4  ;;  %718 = vmatmul.f32.gmra.mxu1 %v2646_v5  ;;  %v1752_v4 = vld [vmem:[%s3170_s2 + $0x670] sm:$0xff] }
  0x7e   : > { %809 = vmatmul.f32.gmra.mxu3 %v764_v6  ;;  %870 = vmatpush.msra.mxu0 %v1680_v7  ;;  %v1785_v7 = vld [vmem:[%s3170_s2 + $0x778] sm:$0xff] }
  0x7f   : > { %893 = vmatpush.msra.mxu1 %v1681_v8  ;;  %961 = vmatpush.msra.mxu2 %v1712_v9  ;;  %v1750_v8 = vld [vmem:[%s3170_s2 + $0x660] sm:$0xff]  ;;  %v1751_v9 = vld [vmem:[%s3170_s2 + $0x668] sm:$0xff] }
  0x80   : > { %984 = vmatpush.msra.mxu3 %v1713_v10  ;;  %692 = vmatmul.f32.vlgmr.msrb.gmra.mxu0 %v2540_v31  ;;  %v1800_v31 = vld [vmem:[%s3170_s2 + $0x7f0] sm:$0xff]  ;;  %v1782_v10 = vld [vmem:[%s3170_s2 + $0x760] sm:$0xff] }
  0x81   : > { %871 = vmatpush.msra.mxu0 %v1678_v11  ;;  %894 = vmatpush.msra.mxu1 %v1679_v12  ;;  %v1783_v11 = vld [vmem:[%s3170_s2 + $0x768] sm:$0xff]  ;;  %v1748_v12 = vld [vmem:[%s3170_s2 + $0x650] sm:$0xff] }
  0x82   : > { %962 = vmatpush.msra.mxu2 %v1710_v13  ;;  %985 = vmatpush.msra.mxu3 %v1711_v14  ;;  %v1749_v13 = vld [vmem:[%s3170_s2 + $0x658] sm:$0xff]  ;;  %v1780_v14 = vld [vmem:[%s3170_s2 + $0x750] sm:$0xff] }
  0x83   : > { %872 = vmatpush.msra.mxu0 %v1676_v15  ;;  %895 = vmatpush.msra.mxu1 %v1677_v16  ;;  %v1781_v15 = vld [vmem:[%s3170_s2 + $0x758] sm:$0xff]  ;;  %v1746_v16 = vld [vmem:[%s3170_s2 + $0x640] sm:$0xff] }
  0x84   : > { %963 = vmatpush.msra.mxu2 %v1708_v19  ;;  %986 = vmatpush.msra.mxu3 %v1709_v20  ;;  %v1779_v19 = vld [vmem:[%s3170_s2 + $0x748] sm:$0xff]  ;;  %v1744_v20 = vld [vmem:[%s3170_s2 + $0x630] sm:$0xff] }
  0x85   : > { %786 = vmatmul.f32.gmra.mxu2 %v764_v6  ;;  %873 = vmatpush.msra.mxu0 %v1674_v23  ;;  %v1784_v6 = vld [vmem:[%s3170_s2 + $0x770] sm:$0xff]  ;;  %v1777_v23 = vld [vmem:[%s3170_s2 + $0x738] sm:$0xff] }
  0x86   : > { %896 = vmatpush.msra.mxu1 %v1675_v24  ;;  %964 = vmatpush.msra.mxu2 %v1706_v25  ;;  %v1742_v24 = vld [vmem:[%s3170_s2 + $0x620] sm:$0xff]  ;;  %v1743_v25 = vld [vmem:[%s3170_s2 + $0x628] sm:$0xff] }
  0x87   : > { %987 = vmatpush.msra.mxu3 %v1707_v26  ;;  %897 = vmatmul.f32.vlgmr.msra.gmra.mxu1 %v2707_v27  ;;  %v1774_v26 = vld [vmem:[%s3170_s2 + $0x720] sm:$0xff] }
  0x88   : > { %988 = vmatmul.f32.vlgmr.msra.gmra.mxu3 %v944_v28  ;;  %1040 = vmatpush.msrb.mxu0 %v1768_v29  ;;  %v1741_v29 = vld [vmem:[%s3170_s2 + $0x618] sm:$0xff] }
  0x89   : > { %1063 = vmatpush.msrb.mxu1 %v1769_v30  ;;  %1131 = vmatpush.msrb.mxu2 %v1800_v31  ;;  %v1033_v30 = vrot.slane %v2376_v38, 6  ;;  %v1034_v31 = vrot.slane %v2379_v39, 6 }
  0x8a   : > { %1154 = vmatpush.msrb.mxu3 %v1801_v32  ;;  %1041 = vmatpush.msrb.mxu0 %v1766_v33  ;;  %v1772_v32 = vld [vmem:[%s3170_s2 + $0x710] sm:$0xff]  ;;  %v1773_v33 = vld [vmem:[%s3170_s2 + $0x718] sm:$0xff] }
  0x8b   : > { %1064 = vmatpush.msrb.mxu1 %v1767_v34  ;;  %1132 = vmatpush.msrb.mxu2 %v1798_v35  ;;  %v1124_v34 = vrot.slane %v2376_v38, 7  ;;  %v1125_v35 = vrot.slane %v2379_v39, 7  ;;  %v1771_v38 = vld [vmem:[%s3170_s2 + $0x708] sm:$0xff]  ;;  %v1035_v41 = vsel %vm1032_vm5, %v1033_v30, %v1034_v31 }
  0x8c   : > { %1155 = vmatpush.msrb.mxu3 %v1799_v36  ;;  %695 = vmatmul.f32.gmra.mxu0 %v2646_v5  ;;  %v1753_v5 = vld [vmem:[%s3170_s2 + $0x678] sm:$0xff]  ;;  %v1738_v36 = vld [vmem:[%s3170_s2 + $0x600] sm:$0xff] }
  0x8d   : > { %1042 = vmatpush.msrb.mxu0 %v1764_v37  ;;  %1065 = vmatpush.msrb.mxu1 %v1765_v40  ;;  %v1739_v37 = vld [vmem:[%s3170_s2 + $0x608] sm:$0xff]  ;;  %v1770_v40 = vld [vmem:[%s3170_s2 + $0x700] sm:$0xff] }
  0x8e   : > { %1133 = vmatpush.msrb.mxu2 %v1796_v42  ;;  %1156 = vmatpush.msrb.mxu3 %v1797_v43  ;;  %v1126_v42 = vsel %vm1123_vm6, %v1124_v34, %v1125_v35  ;;  %v1832_v43 = vld [vmem:[%s3170_s2 + $0x8f0] sm:$0xff] }
  0x8f   : > { %1043 = vmatpush.msrb.mxu0 %v1762_v45  ;;  %1066 = vmatpush.msrb.mxu1 %v1763_v46  ;;  %v1830_v45 = vld [vmem:[%s3170_s2 + $0x8e0] sm:$0xff]  ;;  %v1831_v46 = vld [vmem:[%s3170_s2 + $0x8e8] sm:$0xff] }
  0x90   : > { %1134 = vmatpush.msrb.mxu2 %v1794_v47  ;;  %1157 = vmatpush.msrb.mxu3 %v1795_v48  ;;  %v1828_v47 = vld [vmem:[%s3170_s2 + $0x8d0] sm:$0xff]  ;;  %v1036_v48 = vrot.slane %v2440_v61, 6 }
  0x91   : > { %965 = vmatmul.f32.vlgmr.msra.gmra.mxu2 %v944_v28  ;;  %900 = vmatmul.f32.gmra.mxu1 %v2763_v49  ;;  %v1740_v28 = vld [vmem:[%s3170_s2 + $0x610] sm:$0xff] }
  0x92   : > { %991 = vmatmul.f32.gmra.mxu3 %v2766_v50  ;;  %1044 = vmatpush.msrb.mxu0 %v1760_v51  ;;  %v1826_v51 = vld [vmem:[%s3170_s2 + $0x8c0] sm:$0xff] }
  0x93   : > { %1067 = vmatpush.msrb.mxu1 %v1761_v52  ;;  %1135 = vmatpush.msrb.mxu2 %v1792_v53  ;;  %v1827_v52 = vld [vmem:[%s3170_s2 + $0x8c8] sm:$0xff]  ;;  %v1037_v53 = vsel %vm1032_vm5, %v1034_v31, %v1036_v48 }
  0x94   : > { %1158 = vmatpush.msrb.mxu3 %v1793_v54  ;;  %1045 = vmatpush.msrb.mxu0 %v1758_v55  ;;  %v1824_v55 = vld [vmem:[%s3170_s2 + $0x8b0] sm:$0xff] }
  0x95   : > { %1068 = vmatpush.msrb.mxu1 %v1759_v56  ;;  %1136 = vmatpush.msrb.mxu2 %v1790_v57  ;;  %v1825_v56 = vld [vmem:[%s3170_s2 + $0x8b8] sm:$0xff]  ;;  %v1822_v57 = vld [vmem:[%s3170_s2 + $0x8a0] sm:$0xff] }
  0x96   : > { %1159 = vmatpush.msrb.mxu3 %v1791_v58  ;;  %874 = vmatmul.f32.vlgmr.msra.gmra.mxu0 %v2707_v27  ;;  %v1775_v27 = vld [vmem:[%s3170_s2 + $0x728] sm:$0xff] }
  0x97   : > { %1046 = vmatpush.msrb.mxu0 %v1756_v59  ;;  %1069 = vmatpush.msrb.mxu1 %v1757_v60  ;;  %v1823_v58 = vld [vmem:[%s3170_s2 + $0x8a8] sm:$0xff]  ;;  %v1820_v59 = vld [vmem:[%s3170_s2 + $0x890] sm:$0xff]  ;;  %v1821_v60 = vld [vmem:[%s3170_s2 + $0x898] sm:$0xff] }
  0x98   : > { %1137 = vmatpush.msrb.mxu2 %v1788_v62  ;;  %1160 = vmatpush.msrb.mxu3 %v1789_v63  ;;  %v1818_v62 = vld [vmem:[%s3170_s2 + $0x880] sm:$0xff]  ;;  %v1819_v63 = vld [vmem:[%s3170_s2 + $0x888] sm:$0xff] }
  0x99   : > { %1047 = vmatpush.msrb.mxu0 %v1754_v0  ;;  %1070 = vmatpush.msrb.mxu1 %v1755_v1  ;;  %v1816_v0 = vld [vmem:[%s3170_s2 + $0x870] sm:$0xff]  ;;  %v1817_v1 = vld [vmem:[%s3170_s2 + $0x878] sm:$0xff] }
  0x9a   : > { %1138 = vmatpush.msrb.mxu2 %v1786_v2  ;;  %1161 = vmatpush.msrb.mxu3 %v1787_v3  ;;  %v1814_v2 = vld [vmem:[%s3170_s2 + $0x860] sm:$0xff]  ;;  %v1815_v3 = vld [vmem:[%s3170_s2 + $0x868] sm:$0xff] }
  0x9b   : > { %1048 = vmatpush.msrb.mxu0 %v1752_v4  ;;  %1071 = vmatpush.msrb.mxu1 %v1753_v5  ;;  %v1812_v4 = vld [vmem:[%s3170_s2 + $0x850] sm:$0xff]  ;;  %v1813_v5 = vld [vmem:[%s3170_s2 + $0x858] sm:$0xff] }
  0x9c   : > { %1139 = vmatpush.msrb.mxu2 %v1784_v6  ;;  %1162 = vmatpush.msrb.mxu3 %v1785_v7  ;;  %v1810_v6 = vld [vmem:[%s3170_s2 + $0x840] sm:$0xff]  ;;  %v1811_v7 = vld [vmem:[%s3170_s2 + $0x848] sm:$0xff] }
  0x9d   : > { %1049 = vmatpush.msrb.mxu0 %v1750_v8  ;;  %1072 = vmatpush.msrb.mxu1 %v1751_v9  ;;  %v1808_v8 = vld [vmem:[%s3170_s2 + $0x830] sm:$0xff]  ;;  %v1809_v9 = vld [vmem:[%s3170_s2 + $0x838] sm:$0xff] }
  0x9e   : > { %1140 = vmatpush.msrb.mxu2 %v1782_v10  ;;  %1163 = vmatpush.msrb.mxu3 %v1783_v11  ;;  %v1806_v10 = vld [vmem:[%s3170_s2 + $0x820] sm:$0xff]  ;;  %v1807_v11 = vld [vmem:[%s3170_s2 + $0x828] sm:$0xff] }
  0x9f   : > { %1050 = vmatpush.msrb.mxu0 %v1748_v12  ;;  %1073 = vmatpush.msrb.mxu1 %v1749_v13  ;;  %v1804_v12 = vld [vmem:[%s3170_s2 + $0x810] sm:$0xff]  ;;  %v1805_v13 = vld [vmem:[%s3170_s2 + $0x818] sm:$0xff] }
  0xa0   : > { %1141 = vmatpush.msrb.mxu2 %v1780_v14  ;;  %1164 = vmatpush.msrb.mxu3 %v1781_v15  ;;  %v1802_v14 = vld [vmem:[%s3170_s2 + $0x800] sm:$0xff]  ;;  %v1803_v15 = vld [vmem:[%s3170_s2 + $0x808] sm:$0xff] }
  0xa1   : > { %1051 = vmatpush.msrb.mxu0 %v1746_v16  ;;  %1074 = vmatpush.msrb.mxu1 %v1747_v17 }
  0xa2   : > { %1142 = vmatpush.msrb.mxu2 %v1778_v18  ;;  %1165 = vmatpush.msrb.mxu3 %v1779_v19 }
  0xa3   : > { %877 = vmatmul.f32.gmra.mxu0 %v2763_v49  ;;  %968 = vmatmul.f32.gmra.mxu2 %v2766_v50  ;;  %v1829_v49 = vld [vmem:[%s3170_s2 + $0x8d8] sm:$0xff]  ;;  %v1127_v50 = vrot.slane %v2440_v61, 7 }
  0xa4   : > { %1052 = vmatpush.msrb.mxu0 %v1744_v20  ;;  %1075 = vmatpush.msrb.mxu1 %v1745_v21 }
  0xa5   : > { %1143 = vmatpush.msrb.mxu2 %v1776_v22  ;;  %1166 = vmatpush.msrb.mxu3 %v1777_v23  ;;  %v1128_v54 = vsel %vm1123_vm6, %v1125_v35, %v1127_v50 }
  0xa6   : > { %1053 = vmatpush.msrb.mxu0 %v1742_v24  ;;  %1076 = vmatpush.msrb.mxu1 %v1743_v25 }
  0xa7   : > { %1144 = vmatpush.msrb.mxu2 %v1774_v26  ;;  %1167 = vmatpush.msrb.mxu3 %v1775_v27 }
  0xa8   : > { %1054 = vmatpush.msrb.mxu0 %v1740_v28  ;;  %1077 = vmatpush.msrb.mxu1 %v1741_v29 }
  0xa9   : > { %1145 = vmatpush.msrb.mxu2 %v1772_v32  ;;  %1168 = vmatpush.msrb.mxu3 %v1773_v33 }
  0xaa   : > { %1055 = vmatpush.msrb.mxu0 %v1738_v36  ;;  %1078 = vmatpush.msrb.mxu1 %v1739_v37 }
  0xab   : > { %1146 = vmatpush.msrb.mxu2 %v1770_v40  ;;  %1169 = vmatpush.msrb.mxu3 %v1771_v38 }
  0xac   : > { %1056 = vmatmul.f32.vlgmr.msrb.gmra.mxu0 %v1035_v41  ;;  %1079 = vmatmul.f32.vlgmr.msrb.gmra.mxu1 %v1035_v41 }
  0xad   : > { %1147 = vmatmul.f32.vlgmr.msrb.gmra.mxu2 %v1126_v42  ;;  %1170 = vmatmul.f32.vlgmr.msrb.gmra.mxu3 %v1126_v42 }
  0xae   : > { %1214 = vmatpush.msra.mxu0 %v1832_v43  ;;  %1841 = vmatpush.msra.mxu2 %v1832_v43 }
  0xaf   : > { %1237 = vmatpush.msra.mxu1 %v1833_v44  ;;  %1857 = vmatpush.msra.mxu3 %v1833_v44 }
  0xb0   : > { %1215 = vmatpush.msra.mxu0 %v1830_v45  ;;  %1842 = vmatpush.msra.mxu2 %v1830_v45 }
  0xb1   : > { %1238 = vmatpush.msra.mxu1 %v1831_v46  ;;  %1858 = vmatpush.msra.mxu3 %v1831_v46 }
  0xb2   : > { %1216 = vmatpush.msra.mxu0 %v1828_v47  ;;  %1843 = vmatpush.msra.mxu2 %v1828_v47 }
  0xb3   : > { %1239 = vmatpush.msra.mxu1 %v1829_v49  ;;  %1859 = vmatpush.msra.mxu3 %v1829_v49 }
  0xb4   : > { %1217 = vmatpush.msra.mxu0 %v1826_v51  ;;  %1844 = vmatpush.msra.mxu2 %v1826_v51 }
  0xb5   : > { %1240 = vmatpush.msra.mxu1 %v1827_v52  ;;  %1860 = vmatpush.msra.mxu3 %v1827_v52 }
  0xb6   : > { %1059 = vmatmul.f32.gmra.mxu0 %v1037_v53  ;;  %1082 = vmatmul.f32.gmra.mxu1 %v1037_v53 }
  0xb7   : > { %1150 = vmatmul.f32.gmra.mxu2 %v1128_v54  ;;  %1173 = vmatmul.f32.gmra.mxu3 %v1128_v54 }
  0xb8   : > { %1218 = vmatpush.msra.mxu0 %v1824_v55  ;;  %1845 = vmatpush.msra.mxu2 %v1824_v55 }
  0xb9   : > { %1241 = vmatpush.msra.mxu1 %v1825_v56  ;;  %1861 = vmatpush.msra.mxu3 %v1825_v56 }
  0xba   : > { %1219 = vmatpush.msra.mxu0 %v1822_v57  ;;  %1846 = vmatpush.msra.mxu2 %v1822_v57  ;;  %v1274_v57 = vlaneseq }
  0xbb   : > { %1242 = vmatpush.msra.mxu1 %v1823_v58  ;;  %1862 = vmatpush.msra.mxu3 %v1823_v58 }
  0xbc   : > { %1220 = vmatpush.msra.mxu0 %v1820_v59  ;;  %1847 = vmatpush.msra.mxu2 %v1820_v59 }
  0xbd   : > { %1243 = vmatpush.msra.mxu1 %v1821_v60  ;;  %1863 = vmatpush.msra.mxu3 %v1821_v60 }
  0xbe   : > { %1221 = vmatpush.msra.mxu0 %v1818_v62  ;;  %1848 = vmatpush.msra.mxu2 %v1818_v62 }
  0xbf   : > { %1244 = vmatpush.msra.mxu1 %v1819_v63  ;;  %1864 = vmatpush.msra.mxu3 %v1819_v63 }
  0xc0   : > { %1222 = vmatpush.msra.mxu0 %v1816_v0  ;;  %1849 = vmatpush.msra.mxu2 %v1816_v0 }
  0xc1   : > { %1245 = vmatpush.msra.mxu1 %v1817_v1  ;;  %1865 = vmatpush.msra.mxu3 %v1817_v1  ;;  %v1275_v1 = vshrl.u32 %v1274_v57, 7 }
  0xc2   : > { %1223 = vmatpush.msra.mxu0 %v1814_v2  ;;  %1850 = vmatpush.msra.mxu2 %v1814_v2 }
  0xc3   : > { %1246 = vmatpush.msra.mxu1 %v1815_v3  ;;  %1866 = vmatpush.msra.mxu3 %v1815_v3 }
  0xc4   : > { %1224 = vmatpush.msra.mxu0 %v1812_v4  ;;  %1851 = vmatpush.msra.mxu2 %v1812_v4 }
  0xc5   : > { %1247 = vmatpush.msra.mxu1 %v1813_v5  ;;  %1867 = vmatpush.msra.mxu3 %v1813_v5 }
  0xc6   : > { %1225 = vmatpush.msra.mxu0 %v1810_v6  ;;  %1852 = vmatpush.msra.mxu2 %v1810_v6 }
  0xc7   : > { %1248 = vmatpush.msra.mxu1 %v1811_v7  ;;  %1868 = vmatpush.msra.mxu3 %v1811_v7 }
  0xc8   : > { %1226 = vmatpush.msra.mxu0 %v1808_v8  ;;  %1853 = vmatpush.msra.mxu2 %v1808_v8  ;;  %v1264_v8 = vld [vmem:[%s3171_s3] sm:$0x3] }
  0xc9   : > { %1249 = vmatpush.msra.mxu1 %v1809_v9  ;;  %1869 = vmatpush.msra.mxu3 %v1809_v9  ;;  %v1276_v9 = vadd.s32 8, %v1275_v1 }
  0xca   : > { %1227 = vmatpush.msra.mxu0 %v1806_v10  ;;  %1854 = vmatpush.msra.mxu2 %v1806_v10 }
  0xcb   : > { %1250 = vmatpush.msra.mxu1 %v1807_v11  ;;  %1870 = vmatpush.msra.mxu3 %v1807_v11  ;;  %v1278_v11 = vstv %s1834_s28 }
  0xcc   : > { %1228 = vmatpush.msra.mxu0 %v1804_v12  ;;  %1855 = vmatpush.msra.mxu2 %v1804_v12 }
  0xcd   : > { %1251 = vmatpush.msra.mxu1 %v1805_v13  ;;  %1871 = vmatpush.msra.mxu3 %v1805_v13 }
  0xce   : > { %1229 = vmatpush.msra.mxu0 %v1802_v14  ;;  %1856 = vmatpush.msra.mxu2 %v1802_v14 }
  0xcf   : > { %1252 = vmatpush.msra.mxu1 %v1803_v15  ;;  %1872 = vmatpush.msra.mxu3 %v1803_v15 }
  0xd0   : > { %1230 = vmatmul.f32.vlgmr.msra.gmra.mxu0 %v2379_v39  ;;  %1233 = vmatmul.f32.vlgmr.msra.gmra.mxu2 %v2440_v61 }
  0xd1   : > { %1253 = vmatmul.f32.vlgmr.msra.gmra.mxu1 %v2379_v39  ;;  %1256 = vmatmul.f32.vlgmr.msra.gmra.mxu3 %v2440_v61 }
  0xd5   : > { %v583_v17 = vpop.f32.mrf.mxu1 }
  0xd7   : > { %v629_v19 = vpop.f32.mrf.mxu3 }
  0xd8   : > { %v630_v44 = vadd.f32 %v629_v19, %v583_v17  ;;  %v1266_v17 = vperm.slane %v1264_v8, 0 }
  0xde   : > { %v560_v16 = vpop.f32.mrf.mxu0 }
  0xdf   : > { %v586_v21 = vpop.f32.mrf.mxu1 }
  0xe0   : > { %v632_v23 = vpop.f32.mrf.mxu3 }
  0xe1   : > { %v633_v49 = vadd.f32 %v632_v23, %v586_v21 }
  0xe5   : > { %v606_v18 = vpop.f32.mrf.mxu2 }
  0xe6   : > { %v607_v37 = vadd.f32 %v606_v18, %v560_v16  ;;  %v1267_v18 = vperm.slane %v1264_v8, 1 }
  0xe8   : > { %v716_v25 = vpop.f32.mrf.mxu1 }
  0xe9   : > { %v723_v50 = vadd.f32 %v716_v25, %v630_v44 }
  0xea   : > { %v807_v27 = vpop.f32.mrf.mxu3 }
  0xeb   : > { %v814_v55 = vadd.f32 %v807_v27, %v723_v50  ;;  %v1296_v50 = vld [vmem:[#allocation2] sm:$0x1] }
  0xf3   : > { %v563_v20 = vpop.f32.mrf.mxu0 }
  0xf5   : > { %v609_v22 = vpop.f32.mrf.mxu2 }
  0xf6   : > { %v610_v41 = vadd.f32 %v609_v22, %v563_v20  ;;  %v1279_v20 = vadd.s32 %v1278_v11, %v1275_v1  ;;  %v1280_v22 = vadd.s32 %v1278_v11, %v1276_v9 }
  0xf8   : > { %vm1281_vm7 = vcmp.lt.s32.totalorder %v1279_v20, 50  ;;  %vm1282_vm8 = vcmp.lt.s32.totalorder %v1280_v22, 50 }
  0xfa   : > { %v719_v29 = vpop.f32.mrf.mxu1 }
  0xfb   : > { %v725_v56 = vadd.f32 %v719_v29, %v633_v49 }
  0xfd   : > { %v693_v24 = vpop.f32.mrf.mxu0 }
  0xfe   : > { %v784_v26 = vpop.f32.mrf.mxu2  ;;  %v722_v43 = vadd.f32 %v693_v24, %v607_v37 }
 0x100   : > { %v813_v47 = vadd.f32 %v784_v26, %v722_v43 }
 0x101   : > { %v810_v31 = vpop.f32.mrf.mxu3 }
 0x102   : > { %v816_v62 = vadd.f32 %v810_v31, %v725_v56 }
 0x104   : > { %v898_v39 = vpop.f32.mrf.mxu1 }
 0x105   : > { %v905_v59 = vadd.f32 %v898_v39, %v814_v55 }
 0x108   : > { %v787_v30 = vpop.f32.mrf.mxu2 }
 0x109   : > { %v696_v28 = vpop.f32.mrf.mxu0 }
 0x10a   : > { %v724_v45 = vadd.f32 %v696_v28, %v610_v41 }
 0x10b   : > { %v989_v61 = vpop.f32.mrf.mxu3 }
 0x10c   : > { %v815_v51 = vadd.f32 %v787_v30, %v724_v45  ;;  %v996_v63 = vadd.f32 %v989_v61, %v905_v59 }
 0x10e   : > { %v901_v35 = vpop.f32.mrf.mxu1 }
 0x10f   : > { %v907_v5 = vadd.f32 %v901_v35, %v816_v62 }
 0x113   : > { %v875_v32 = vpop.f32.mrf.mxu0 }
 0x114   : > { %v966_v33 = vpop.f32.mrf.mxu2  ;;  %v904_v53 = vadd.f32 %v875_v32, %v813_v47  ;;  %v1334_v47 = vld [vmem:[#allocation5] sm:$0x1] }
 0x115   : > { %v992_v40 = vpop.f32.mrf.mxu3 }
 0x116   : > { %v995_v60 = vadd.f32 %v966_v33, %v904_v53  ;;  %v998_v13 = vadd.f32 %v992_v40, %v907_v5 }
 0x120   : > { %v878_v34 = vpop.f32.mrf.mxu0 }
 0x121   : > { %v906_v58 = vadd.f32 %v878_v34, %v815_v51 }
 0x126   : > { %v969_v36 = vpop.f32.mrf.mxu2 }
 0x127   : > { %v997_v2 = vadd.f32 %v969_v36, %v906_v58 }
 0x129   : > { %v1057_v38 = vpop.f32.mrf.mxu0  ;;  %v1080_v42 = vpop.f32.mrf.mxu1 }
 0x12a   : > { %v1086_v3 = vadd.f32 %v1057_v38, %v995_v60  ;;  %v1087_v6 = vadd.f32 %v1080_v42, %v996_v63 }
 0x130   : > { %v1148_v46 = vpop.f32.mrf.mxu2  ;;  %v1171_v48 = vpop.f32.mrf.mxu3 }
 0x131   : > { %v1177_v10 = vadd.f32 %v1148_v46, %v1086_v3  ;;  %v1178_v14 = vadd.f32 %v1171_v48, %v1087_v6 }
 0x133   : > { %v1060_v52 = vpop.f32.mrf.mxu0  ;;  %v1083_v54 = vpop.f32.mrf.mxu1 }
 0x134   : > { %v1088_v15 = vadd.f32 %v1060_v52, %v997_v2  ;;  %v1089_v19 = vadd.f32 %v1083_v54, %v998_v13 }
 0x13a   : > { %v1151_v0 = vpop.f32.mrf.mxu2  ;;  %v1174_v4 = vpop.f32.mrf.mxu3 }
 0x13b   : > { %v1179_v23 = vadd.f32 %v1151_v0, %v1088_v15  ;;  %v1180_v24 = vadd.f32 %v1174_v4, %v1089_v19  ;;  %v1321_v15 = vld [vmem:[#allocation4] sm:$0x1] }
 0x14d   : > { %v1231_v7 = vpop.f32.mrf.mxu0 }
 0x14e   : > { %v1254_v12 = vpop.f32.mrf.mxu1  ;;  %v1260_v16 = vadd.f32 %v1231_v7, %v1177_v10 }
 0x14f   : > { %v1261_v21 = vadd.f32 %v1254_v12, %v1178_v14  ;;  %v1310_v12 = vld [vmem:[#allocation3] sm:$0x1] }
 0x150   : > { %v1270_v26 = vadd.f32 %v1266_v17, %v1260_v16 }
 0x151   : > { %v1271_v29 = vadd.f32 %v1267_v18, %v1261_v21 }
 0x152   : > { %v1335_v39 = vsel %vm1281_vm7, %v1270_v26, -inf }
 0x153   : > { %v1234_v25 = vpop.f32.mrf.mxu2  ;;  %v1287_v61 = vsel %vm1281_vm7, %v1271_v29, -inf }
 0x154   : > { %v1262_v27 = vadd.f32 %v1234_v25, %v1179_v23  ;;  %v1257_v28 = vpop.f32.mrf.mxu3 }
 0x155   : > { %v1263_v30 = vadd.f32 %v1257_v28, %v1180_v24 }
 0x156   : > { %v1272_v31 = vadd.f32 %v1266_v17, %v1262_v27 }
 0x157   : > { %v1273_v32 = vadd.f32 %v1267_v18, %v1263_v30 }
 0x158   : > { %v1336_v33 = vsel %vm1282_vm8, %v1272_v31, -inf }
 0x159   : > { %v1337_v34 = vmax.f32 %v1335_v39, %v1336_v33  ;;  %v1288_v35 = vsel %vm1282_vm8, %v1273_v32, -inf }
 0x15a   : > { %v1289_v36 = vmax.f32 %v1287_v61, %v1288_v35 }
 0x15b   : > { %v1338_v37 = vrot.slane %v1337_v34, 4 }
 0x15c   : > { %v1290_v40 = vrot.slane %v1289_v36, 4 }
 0x15d   : > { %v1339_v38 = vmax.f32 %v1337_v34, %v1338_v37 }
 0x15e   : > { %v1291_v41 = vmax.f32 %v1289_v36, %v1290_v40 }
 0x15f   : > { %v1340_v42 = vrot.slane %v1339_v38, 2 }
 0x160   : > { %v1292_v43 = vrot.slane %v1291_v41, 2 }
 0x161   : > { %v1341_v44 = vmax.f32 %v1339_v38, %v1340_v42 }
 0x162   : > { %v1293_v45 = vmax.f32 %v1291_v41, %v1292_v43 }
 0x163   : > { %v1342_v46 = vrot.slane %v1341_v44, 1 }
 0x164   : > { %v1294_v48 = vrot.slane %v1293_v45, 1 }
 0x165   : > { %v1343_v49 = vmax.f32 %v1341_v44, %v1342_v46 }
 0x166   : > { %v1295_v51 = vmax.f32 %v1293_v45, %v1294_v48 }
 0x167   : > { %v1344_v52 = vmax.f32 %v1334_v47, %v1343_v49 }
 0x168   : > { %v1297_v53 = vmax.f32 %v1296_v50, %v1295_v51 }
 0x169   : > { %1345 = vst [vmem:[#allocation5] sm:$0x1] %v1344_v52 }
 0x16a   : > { %v1302_v54 = vperm.slane %v1297_v53, 0  ;;  %1346 = vst [vmem:[#allocation2] sm:$0x1] %v1297_v53  ;;  %v1298_v59 = vsub.f32 %v1296_v50, %v1297_v53 }
 0x16c   : > { %v1304_v55 = vsub.f32 %v1287_v61, %v1302_v54  ;;  %v1305_v56 = vsub.f32 %v1288_v35, %v1302_v54  ;;  %v1299_v63 = vmul.f32 1.442695, %v1298_v59 }
 0x16e   : > { %v1306_v57 = vmul.f32 1.442695, %v1304_v55  ;;  %v1308_v58 = vmul.f32 1.442695, %v1305_v56 }
 0x170   : > { %1916 = vpow2.f32 %v1306_v57 }
 0x171   : > { %1918 = vpow2.f32 %v1308_v58 }
 0x172   : > { %1920 = vpow2.f32 %v1299_v63 }
 0x176   : > { %v1917_v60 = vpop.eup %1916 }
 0x177   : > { %v1919_v62 = vpop.eup %1918  ;;  %v1323_v0 = vmul.f32 %v1917_v60, %v1270_v26 }
 0x178   : > { %v1312_v1 = vadd.f32 %v1919_v62, %v1917_v60  ;;  %v1324_v2 = vmul.f32 %v1919_v62, %v1272_v31  ;;  %v1921_v11 = vpop.eup %1920 }
 0x179   : > { %v1311_v16 = vmul.f32 %v1921_v11, %v1310_v12  ;;  %v1322_v20 = vmul.f32 %v1921_v11, %v1321_v15 }
 0x17a   : > { %v1313_v3 = vrot.slane %v1312_v1, 4  ;;  %v1325_v4 = vadd.f32 %v1324_v2, %v1323_v0 }
 0x17c   : > { %v1314_v5 = vadd.f32 %v1313_v3, %v1312_v1  ;;  %v1326_v6 = vrot.slane %v1325_v4, 4 }
 0x17e   : > { %v1315_v7 = vrot.slane %v1314_v5, 2  ;;  %v1327_v8 = vadd.f32 %v1326_v6, %v1325_v4 }
 0x180   : > { %v1316_v9 = vadd.f32 %v1315_v7, %v1314_v5  ;;  %v1328_v10 = vrot.slane %v1327_v8, 2 }
 0x182   : > { %v1317_v13 = vrot.slane %v1316_v9, 1  ;;  %v1329_v14 = vadd.f32 %v1328_v10, %v1327_v8 }
 0x184   : > { %v1318_v17 = vadd.f32 %v1317_v13, %v1316_v9  ;;  %v1330_v18 = vrot.slane %v1329_v14, 1 }
 0x186   : > { %v1319_v19 = vadd.f32 %v1318_v17, %v1311_v16  ;;  %v1331_v21 = vadd.f32 %v1330_v18, %v1329_v14  ;;  %1350 = sbr.rel (%p1835_p9) target bundleno = 701 (0x2bd), region = 72 }
 0x188   : > { %1320 = vst [vmem:[#allocation3] sm:$0x1] %v1319_v19  ;;  %v1332_v22 = vadd.f32 %v1331_v21, %v1322_v20 }
 0x18a   : > { %1333 = vst [vmem:[#allocation4] sm:$0x1] %v1332_v22 }
 0x18b   : > { %v1400_v23 = vld [vmem:[%s3173_s5 + $0x78] sm:$0xff]  ;;  %v1399_v25 = vld [vmem:[%s3173_s5 + $0x70] sm:$0xff]  ;;  %v1398_v27 = vld [vmem:[%s3173_s5 + $0x68] sm:$0xff]  ;;  %vm1453_vm13 = vcmask 261120  }
 0x18c   : > { %v1384_v24 = vld [vmem:[%s3172_s4 + $0x78] sm:$0xff]  ;;  %1401 = vmatpush.msra.mxu0 %v1400_v23  ;;  %v1383_v26 = vld [vmem:[%s3172_s4 + $0x70] sm:$0xff]  ;;  %v1382_v28 = vld [vmem:[%s3172_s4 + $0x68] sm:$0xff] }
 0x18d   : > { %1421 = vmatpush.msra.mxu1 %v1384_v24  ;;  %v1397_v29 = vld [vmem:[%s3173_s5 + $0x60] sm:$0xff]  ;;  %v1396_v31 = vld [vmem:[%s3173_s5 + $0x58] sm:$0xff]  ;;  %v1395_v39 = vld [vmem:[%s3173_s5 + $0x50] sm:$0xff] }
 0x18e   : > { %1402 = vmatpush.msra.mxu0 %v1399_v25  ;;  %v1381_v30 = vld [vmem:[%s3172_s4 + $0x60] sm:$0xff]  ;;  %v1380_v32 = vld [vmem:[%s3172_s4 + $0x58] sm:$0xff]  ;;  %v1379_v33 = vld [vmem:[%s3172_s4 + $0x50] sm:$0xff] }
 0x18f   : > { %1422 = vmatpush.msra.mxu1 %v1383_v26  ;;  %v1394_v61 = vld [vmem:[%s3173_s5 + $0x48] sm:$0xff]  ;;  %v1352_v35 = vld [vmem:[#allocation3] sm:$0x1]  ;;  %v1392_v40 = vld [vmem:[%s3173_s5 + $0x38] sm:$0xff] }
 0x190   : > { %1403 = vmatpush.msra.mxu0 %v1398_v27  ;;  %v1378_v34 = vld [vmem:[%s3172_s4 + $0x48] sm:$0xff]  ;;  %v1393_v36 = vld [vmem:[%s3173_s5 + $0x40] sm:$0xff]  ;;  %1922 = vrcp.f32 %v1352_v35  ;;  %v1376_v38 = vld [vmem:[%s3172_s4 + $0x38] sm:$0xff]  ;;  %v1364_v49 = vand.u32 2147483648, %v1352_v35  ;;  %vm1358_vm9 = vweird.f32 %v1352_v35  ;;  %v1362_v51 = vand.u32 2147483647, %v1352_v35 }
 0x191   : > { %1423 = vmatpush.msra.mxu1 %v1382_v28  ;;  %v1377_v37 = vld [vmem:[%s3172_s4 + $0x40] sm:$0xff]  ;;  %v1391_v41 = vld [vmem:[%s3173_s5 + $0x30] sm:$0xff]  ;;  %v1390_v44 = vld [vmem:[%s3173_s5 + $0x28] sm:$0xff] }
 0x192   : > { %1404 = vmatpush.msra.mxu0 %v1397_v29  ;;  %v1375_v42 = vld [vmem:[%s3172_s4 + $0x30] sm:$0xff]  ;;  %v1374_v45 = vld [vmem:[%s3172_s4 + $0x28] sm:$0xff]  ;;  %v1389_v47 = vld [vmem:[%s3173_s5 + $0x20] sm:$0xff]  ;;  %v1365_v57 = vor.u32 1.1754944e-38, %v1364_v49  ;;  %vm1363_vm12 = vcmp.eq.f32.partialorder %v1362_v51, 8.507059e+37 }
 0x193   : > { %1424 = vmatpush.msra.mxu1 %v1381_v30  ;;  %v1373_v48 = vld [vmem:[%s3172_s4 + $0x20] sm:$0xff]  ;;  %v1388_v52 = vld [vmem:[%s3173_s5 + $0x18] sm:$0xff]  ;;  %v1387_v55 = vld [vmem:[%s3173_s5 + $0x10] sm:$0xff] }
 0x194   : > { %1405 = vmatpush.msra.mxu0 %v1396_v31  ;;  %v1372_v53 = vld [vmem:[%s3172_s4 + $0x18] sm:$0xff]  ;;  %v1371_v56 = vld [vmem:[%s3172_s4 + $0x10] sm:$0xff]  ;;  %v1386_v59 = vld [vmem:[%s3173_s5 + $0x8] sm:$0xff] }
 0x195   : > { %1425 = vmatpush.msra.mxu1 %v1380_v32  ;;  %v1370_v60 = vld [vmem:[%s3172_s4 + $0x8] sm:$0xff]  ;;  %v1351_v62 = vld [vmem:[#allocation4] sm:$0x1]  ;;  %v1368_v3 = vld [vmem:[#allocation5] sm:$0x1] }
 0x196   : > { %1406 = vmatpush.msra.mxu0 %v1395_v39  ;;  %v1923_v43 = vpop.eup %1922  ;;  %v1385_v0 = vld [vmem:[%s3173_s5] sm:$0xff]  ;;  %v1451_v5 = vld [vmem:[%s3177_s9 + $0x18] sm:$0xff]  ;;  %v1450_v6 = vld [vmem:[%s3177_s9 + $0x10] sm:$0xff] }
 0x197   : > { %1426 = vmatpush.msra.mxu1 %v1379_v33  ;;  %v1354_v46 = vmul.f32 %v1923_v43, %v1352_v35  ;;  %vm1359_vm10 = vweird.f32 %v1923_v43  ;;  %v1369_v1 = vld [vmem:[%s3172_s4] sm:$0xff]  ;;  %1469 = vmatpush.msra.mxu2 %v1451_v5  ;;  %v1449_v7 = vld [vmem:[%s3177_s9 + $0x8] sm:$0xff] }
 0x198   : > { %1407 = vmatpush.msra.mxu0 %v1394_v61  ;;  %vm1360_vm11 = vmor %vm1358_vm9, %vm1359_vm10  ;;  %v1448_v8 = vld [vmem:[%s3177_s9] sm:$0xff] }
 0x199   : > { %1427 = vmatpush.msra.mxu1 %v1378_v34  ;;  %v1355_v50 = vsub.f32 1.0, %v1354_v46  ;;  %1470 = vmatpush.msra.mxu2 %v1450_v6  ;;  %v1441_v11 = vld [vmem:[%s3174_s6] sm:$0x1] }
 0x19a   : > { %1408 = vmatpush.msra.mxu0 %v1393_v36  ;;  %v1444_v14 = vld [vmem:[%s3175_s7] sm:$0x1] }
 0x19b   : > { %1428 = vmatpush.msra.mxu1 %v1377_v37  ;;  %v1356_v54 = vmul.f32 %v1923_v43, %v1355_v50  ;;  %1471 = vmatpush.msra.mxu2 %v1449_v7  ;;  %v1446_v16 = vld [vmem:[%s3176_s8] sm:$0x1] }
 0x19c   : > { %1409 = vmatpush.msra.mxu0 %v1392_v40  ;;  %v1452_v19 = vld [vmem:[%s3178_s10] sm:$0x1] }
 0x19d   : > { %1429 = vmatpush.msra.mxu1 %v1376_v38  ;;  %v1357_v58 = vadd.f32 %v1923_v43, %v1356_v54  ;;  %1472 = vmatpush.msra.mxu2 %v1448_v8 }
 0x19e   : > { %1410 = vmatpush.msra.mxu0 %v1391_v41 }
 0x19f   : > { %1430 = vmatpush.msra.mxu1 %v1375_v42  ;;  %v1361_v63 = vsel %vm1360_vm11, %v1923_v43, %v1357_v58 }
 0x1a0   : > { %1411 = vmatpush.msra.mxu0 %v1390_v44  ;;  %v1366_v2 = vsel %vm1363_vm12, %v1365_v57, %v1361_v63 }
 0x1a1   : > { %1431 = vmatpush.msra.mxu1 %v1374_v45  ;;  %v1367_v4 = vmul.f32 %v1366_v2, %v1351_v62 }
 0x1a2   : > { %1412 = vmatpush.msra.mxu0 %v1389_v47 }
 0x1a3   : > { %1432 = vmatpush.msra.mxu1 %v1373_v48 }
 0x1a4   : > { %1413 = vmatpush.msra.mxu0 %v1388_v52 }
 0x1a5   : > { %1433 = vmatpush.msra.mxu1 %v1372_v53 }
 0x1a6   : > { %1414 = vmatpush.msra.mxu0 %v1387_v55 }
 0x1a7   : > { %1434 = vmatpush.msra.mxu1 %v1371_v56 }
 0x1a8   : > { %1415 = vmatpush.msra.mxu0 %v1386_v59 }
 0x1a9   : > { %1435 = vmatpush.msra.mxu1 %v1370_v60 }
 0x1aa   : > { %1416 = vmatpush.msra.mxu0 %v1385_v0 }
 0x1ab   : > { %1436 = vmatpush.msra.mxu1 %v1369_v1  ;;  %1417 = vmatmul.f32.vlgmr.msra.gmra.mxu0 %v1368_v3 }
 0x1ac   : > { %1437 = vmatmul.f32.vlgmr.msra.gmra.mxu1 %v1367_v4 }
 0x228   : > { %v1418_v9 = vpop.f32.mrf.mxu0 }
 0x229   : > { %v1438_v10 = vpop.f32.mrf.mxu1 }
 0x22a   : > { %v1439_v12 = vadd.f32 %v1438_v10, %v1418_v9 }
 0x22c   : > { %v1442_v13 = vadd.f32 %v1441_v11, %v1439_v12 }
 0x22e   : > { %v1443_v15 = vmax.f32 %v1442_v13, 0.0 }
 0x230   : > { %v1445_v17 = vmul.f32 %v1444_v14, %v1443_v15 }
 0x232   : > { %v1447_v18 = vadd.f32 %v1446_v16, %v1445_v17 }
 0x234   : > { %1836 = vmatmul.msk.f32.vlgmr.msra.gmra.mxu2 %vm1453_vm13, %v1447_v18 }
 0x2b7   : > { %v1474_v20 = vpop.f32.mrf.mxu2 }
 0x2b8   : > { %v1475_v21 = vadd.f32 %v1474_v20, %v1452_v19 }
 0x2ba   : > { %v1477_v22 = vperm.slane %v1475_v21, 0 }
 0x2bc   : > { %1478 = vst [vmem:[%s2062_s12] sm:$0xff] %v1477_v22 }
 0x2bd PF: > { %s3188_s17 = sld [smem:[#allocation8_spill]] }
 0x2be   : > { %s3190_s18 = sld [smem:[#allocation7_spill]] }
 0x2bf   : > { %s3191_s19 = sld [smem:[#allocation9_spill]] }
 0x2c0   : > { %s3192_s20 = sld [smem:[#allocation10_spill]] }
 0x2c3   : > { %s21_s21 = sadd.s32 1, %s3188_s17   ;;  %s3189_s17 = sld [smem:[#allocation6_spill]] }
 0x2c4   : > { %p18_p10 = scmp.ge.s32.totalorder %s21_s21, 10  }
 0x2c6   :  { %20 = sbr.rel (!%p18_p10) target bundleno = 3 (0x3), region = 113 }

</bundles_post_ra>
